<compile_context>
chip_gen: v6e
topology: v6e:2x2x1
jax: 0.10.0
libtpu: 0.0.40
codegen_flags: <defaults>
</compile_context>

<pallas_src>
import math

import jax
import jax.numpy as jnp
import numpy as np
from jax.experimental import pallas as pl
from jax.experimental.pallas import tpu as pltpu


# ---------------------------------------------------------------------------
# Pallas kernel: one (batch, head) pair per grid step.
# ---------------------------------------------------------------------------
def _attention_kernel(x_ref, wq_ref, bq_ref, wk_ref, wv_ref, wo_ref,
                      cos_ref, sin_ref, o_ref, acc_ref):
    f32 = jnp.float32
    bf16 = jnp.bfloat16

    h = pl.program_id(1)
    S = x_ref.shape[1]
    hd = wq_ref.shape[2]

    @pl.when(h == 0)
    def _init():
        acc_ref[...] = jnp.zeros_like(acc_ref)

    xb = x_ref[0]                                                     # (S, D) bf16

    # --- per-head projections: full-D contraction on the MXU, f32 accumulation ---
    # (softmax scale is already folded into wq / bq by the wrapper)
    q = jnp.dot(xb, wq_ref[0], preferred_element_type=f32) + bq_ref[0]   # (S, hd) f32
    k = jnp.dot(xb, wk_ref[0], preferred_element_type=f32)               # (S, hd) f32
    v = jnp.dot(xb, wv_ref[0], preferred_element_type=f32)               # (S, hd) f32

    # --- interleaved RoPE in f32: out = x*cos + rot(x)*sin ---
    # rot(x)[2i] = -x[2i+1], rot(x)[2i+1] = x[2i]; applied as one (S,hd)@(hd,hd)
    # matmul against a pair-rotation matrix built in-kernel (no DMA).
    ri = jax.lax.broadcasted_iota(jnp.int32, (hd, hd), 0)
    ci = jax.lax.broadcasted_iota(jnp.int32, (hd, hd), 1)
    rot = (jnp.where((ci == ri + 1) & (ri % 2 == 0), 1.0, 0.0)
           + jnp.where((ci == ri - 1) & (ri % 2 == 1), -1.0, 0.0)).astype(f32)
    cos = cos_ref[...]                                                # (S, hd) f32
    sin = sin_ref[...]                                                # (S, hd) f32
    q = q * cos + jnp.dot(q, rot, preferred_element_type=f32) * sin
    k = k * cos + jnp.dot(k, rot, preferred_element_type=f32) * sin

    # --- scores: explicit contraction over hd (no k.T materialization), bf16 -> MXU ---
    s = jax.lax.dot_general(q.astype(bf16), k.astype(bf16),
                            dimension_numbers=(((1,), (1,)), ((), ())),
                            preferred_element_type=f32)               # (S, S) f32

    # --- causal mask generated in-kernel (cheap VPU iota/compare) ---
    row = jax.lax.broadcasted_iota(jnp.int32, (S, S), 0)
    col = jax.lax.broadcasted_iota(jnp.int32, (S, S), 1)
    s = jnp.where(col <= row, s, jnp.float32(-1e30))

    # --- softmax in f32; normalization deferred to one EUP reciprocal on (S, hd) ---
    m = jnp.max(s, axis=-1, keepdims=True)
    p = jnp.exp(s - m)
    l = jnp.sum(p, axis=-1, keepdims=True)
    o = jnp.dot(p.astype(bf16), v.astype(bf16), preferred_element_type=f32)   # (S, hd)
    o = o * pl.reciprocal(l, approx=True)

    # --- fused output projection: per-head contribution, lane-dense (S, D) accumulate ---
    acc_ref[...] += jnp.dot(o.astype(bf16), wo_ref[0], preferred_element_type=f32)

    @pl.when(h == pl.num_programs(1) - 1)
    def _finalize():
        o_ref[0] = acc_ref[...].astype(o_ref.dtype)


def attention_forward(x, params, cos_full, sin_full, *, n_heads, head_dim):
    """x: (B, S, D) f32. Weights are passed as W^T (so the kernel does x @ W^T)."""
    B, S, D = x.shape
    H, hd = n_heads, head_dim
    scale = 1.0 / math.sqrt(hd)
    bf16 = jnp.bfloat16

    # Host-side prep: per-head weight layout, fold softmax scale into wq/bq,
    # cast all MXU operands to bf16 (accumulation stays f32 in-kernel).
    wq_h = (params["wq_t"] * scale).reshape(D, H, hd).transpose(1, 0, 2).astype(bf16)  # (H, D, hd)
    wk_h = params["wk_t"].reshape(D, H, hd).transpose(1, 0, 2).astype(bf16)            # (H, D, hd)
    wv_h = params["wv_t"].reshape(D, H, hd).transpose(1, 0, 2).astype(bf16)            # (H, D, hd)
    bq_h = (params["bq"] * scale).reshape(H, 1, hd).astype(jnp.float32)                # (H, 1, hd)
    wo_h = params["wo_t"].reshape(H, hd, D).astype(bf16)                               # (H, hd, D)
    x_bf = x.astype(bf16)

    return pl.pallas_call(
        _attention_kernel,
        out_shape=jax.ShapeDtypeStruct((B, S, D), jnp.float32),
        grid_spec=pltpu.PrefetchScalarGridSpec(
            num_scalar_prefetch=0,
            grid=(B, H),                                   # head axis last (reduction/accumulate)
            in_specs=[
                pl.BlockSpec((1, S, D), lambda b, h: (b, 0, 0)),    # x (bf16)
                pl.BlockSpec((1, D, hd), lambda b, h: (h, 0, 0)),   # wq^T per head (scaled, bf16)
                pl.BlockSpec((1, 1, hd), lambda b, h: (h, 0, 0)),   # bq per head (scaled, f32)
                pl.BlockSpec((1, D, hd), lambda b, h: (h, 0, 0)),   # wk^T per head (bf16)
                pl.BlockSpec((1, D, hd), lambda b, h: (h, 0, 0)),   # wv^T per head (bf16)
                pl.BlockSpec((1, hd, D), lambda b, h: (h, 0, 0)),   # wo^T per head (bf16)
                pl.BlockSpec((S, hd), lambda b, h: (0, 0)),         # cos (interleave-duplicated)
                pl.BlockSpec((S, hd), lambda b, h: (0, 0)),         # sin (interleave-duplicated)
            ],
            out_specs=pl.BlockSpec((1, S, D), lambda b, h: (b, 0, 0)),
            scratch_shapes=[pltpu.VMEM((S, D), jnp.float32)],       # fused-wo accumulator
        ),
        compiler_params=pltpu.CompilerParams(
            dimension_semantics=("parallel", "arbitrary")),
    )(x_bf, wq_h, bq_h, wk_h, wv_h, wo_h, cos_full, sin_full)


# ---------------------------------------------------------------------------
# Pure-JAX f32 reference (mirrors the PyTorch module) for validation.
# ---------------------------------------------------------------------------
def _rope_ref(x, cos, sin):
    # x: (B, S, H, hd) ; cos/sin: (S, hd//2) ; interleaved (even/odd adjacent) pairs
    B, S, H, hd = x.shape
    xr = x.reshape(B, S, H, hd // 2, 2)
    xe, xo = xr[..., 0], xr[..., 1]
    c = cos[None, :, None, :]
    s = sin[None, :, None, :]
    oe = xe * c - xo * s
    oo = xe * s + xo * c
    return jnp.stack([oe, oo], axis=-1).reshape(B, S, H, hd)


def attention_reference(x, params, cos, sin, mask, *, n_heads, head_dim):
    B, S, D = x.shape
    xq = x @ params["wq_t"] + params["bq"]
    xk = x @ params["wk_t"]
    xv = x @ params["wv_t"]
    xq = xq.reshape(B, S, n_heads, head_dim)
    xk = xk.reshape(B, S, n_heads, head_dim)
    xv = xv.reshape(B, S, n_heads, head_dim)
    xq = _rope_ref(xq, cos, sin)
    xk = _rope_ref(xk, cos, sin)
    q = xq.transpose(0, 2, 1, 3)        # (B, H, S, hd)
    k = xk.transpose(0, 2, 1, 3)
    v = xv.transpose(0, 2, 1, 3)
    s = jnp.einsum("bhqd,bhkd->bhqk", q, k) / math.sqrt(head_dim) + mask[None, None]
    p = jax.nn.softmax(s, axis=-1)
    o = jnp.einsum("bhqk,bhkd->bhqd", p, v)
    o = o.transpose(0, 2, 1, 3).reshape(B, S, n_heads * head_dim)
    return o @ params["wo_t"]


# ---------------------------------------------------------------------------
# Main
# ---------------------------------------------------------------------------
if __name__ == "__main__":
    # Small config consistent with ModelArgs (n_kv_heads == n_heads, as the module's
    # forward requires — it never repeats KV heads).
    B, S = 2, 128
    dim, n_heads = 256, 4
    head_dim = dim // n_heads            # 64
    rope_theta = 500000.0

    key = jax.random.PRNGKey(0)
    ks = jax.random.split(key, 6)
    x = jax.random.normal(ks[0], (B, S, dim), dtype=jnp.float32)

    # nn.Linear weights are stored (out, in) in torch; we pass W^T so kernel does x @ W^T.
    sc = 0.05
    params = {
        "wq_t": sc * jax.random.normal(ks[1], (dim, n_heads * head_dim), jnp.float32),
        "bq":   sc * jax.random.normal(ks[2], (n_heads * head_dim,), jnp.float32),
        "wk_t": sc * jax.random.normal(ks[3], (dim, n_heads * head_dim), jnp.float32),
        "wv_t": sc * jax.random.normal(ks[4], (dim, n_heads * head_dim), jnp.float32),
        "wo_t": sc * jax.random.normal(ks[5], (n_heads * head_dim, dim), jnp.float32),
    }

    # precompute_freqs_cis equivalent, split into cos / sin.
    freqs = 1.0 / (rope_theta ** (jnp.arange(0, head_dim, 2, dtype=jnp.float32) / head_dim))
    t = jnp.arange(S, dtype=jnp.float32)
    angles = jnp.outer(t, freqs)                    # (S, hd//2)
    cos = jnp.cos(angles)
    sin = jnp.sin(angles)
    # Interleave-duplicate for in-kernel use: cos_full[:, 2i] = cos_full[:, 2i+1] = cos[:, i]
    cos_full = jnp.repeat(cos, 2, axis=-1)          # (S, hd)
    sin_full = jnp.repeat(sin, 2, axis=-1)          # (S, hd)

    out = attention_forward(x, params, cos_full, sin_full,
                            n_heads=n_heads, head_dim=head_dim)
    out = jax.block_until_ready(out)

    # Causal additive mask (float-mask semantics of F.scaled_dot_product_attention).
    neg = jnp.float32(-1e30)
    i_idx = jnp.arange(S)[:, None]
    j_idx = jnp.arange(S)[None, :]
    mask = jnp.where(j_idx <= i_idx, 0.0, neg).astype(jnp.float32)

    ref = attention_reference(x, params, cos, sin, mask,
                              n_heads=n_heads, head_dim=head_dim)

    # bf16 MXU operands + approximate reciprocal -> bf16-appropriate tolerance.
    np.testing.assert_allclose(np.asarray(out), np.asarray(ref), atol=3e-2, rtol=3e-2)
    print("KERNEL_OK")
</pallas_src>

<mosaic_0001>
module attributes {stable_mosaic.version = 11 : i64} {
  func.func @_attention_kernel(%arg0: i32, %arg1: i32, %arg2: memref<1x128x256xbf16, #tpu.memory_space<vmem>>, %arg3: memref<1x256x64xbf16, #tpu.memory_space<vmem>>, %arg4: memref<1x1x64xf32, #tpu.memory_space<vmem>>, %arg5: memref<1x256x64xbf16, #tpu.memory_space<vmem>>, %arg6: memref<1x256x64xbf16, #tpu.memory_space<vmem>>, %arg7: memref<1x64x256xbf16, #tpu.memory_space<vmem>>, %arg8: memref<128x64xf32, #tpu.memory_space<vmem>>, %arg9: memref<128x64xf32, #tpu.memory_space<vmem>>, %arg10: memref<1x128x256xf32, #tpu.memory_space<vmem>>, %arg11: memref<128x256xf32, #tpu.memory_space<vmem>>) attributes {dimension_semantics = [#tpu.dimension_semantics<parallel>, #tpu.dimension_semantics<arbitrary>], iteration_bounds = array<i64: 2, 4>, scalar_prefetch = 0 : i64, scratch_operands = 1 : i64, tpu.core_type = #tpu.core_type<tc>, window_params = [{transform_indices = @transform_0, window_bounds = array<i64: 1, 128, 256>}, {transform_indices = @transform_1, window_bounds = array<i64: 1, 256, 64>}, {transform_indices = @transform_2, window_bounds = array<i64: 1, 1, 64>}, {transform_indices = @transform_3, window_bounds = array<i64: 1, 256, 64>}, {transform_indices = @transform_4, window_bounds = array<i64: 1, 256, 64>}, {transform_indices = @transform_5, window_bounds = array<i64: 1, 64, 256>}, {pipeline_mode = #tpu.pipeline_mode<synchronous>, transform_indices = @transform_6, window_bounds = array<i64: 128, 64>}, {pipeline_mode = #tpu.pipeline_mode<synchronous>, transform_indices = @transform_7, window_bounds = array<i64: 128, 64>}, {transform_indices = @transform_8, window_bounds = array<i64: 1, 128, 256>}]} {
    %c0_i32 = arith.constant 0 : i32
    %0 = arith.cmpi eq, %arg1, %c0_i32 : i32
    %1 = arith.extui %0 : i1 to i32
    %c0_i32_0 = arith.constant 0 : i32
    %2 = arith.cmpi ne, %1, %c0_i32_0 : i32
    scf.if %2 {
      %cst_55 = arith.constant 0.000000e+00 : f32
      %112 = vector.broadcast %cst_55 : f32 to vector<128x256xf32>
      %c0_56 = arith.constant 0 : index
      %c0_57 = arith.constant 0 : index
      %113 = vector.load %arg11[%c0_56, %c0_57] : memref<128x256xf32, #tpu.memory_space<vmem>>, vector<128x256xf32>
      tpu.vector_store %arg11[%c0_56, %c0_57], %112 {strides = array<i32>} : memref<128x256xf32, #tpu.memory_space<vmem>>, vector<128x256xf32>,
    } else {
    }
    %c0 = arith.constant 0 : index
    %c0_1 = arith.constant 0 : index
    %c0_2 = arith.constant 0 : index
    %3 = vector.load %arg2[%c0, %c0_1, %c0_2] : memref<1x128x256xbf16, #tpu.memory_space<vmem>>, vector<1x128x256xbf16>
    %4 = vector.shape_cast %3 : vector<1x128x256xbf16> to vector<128x256xbf16>
    %c0_3 = arith.constant 0 : index
    %c0_4 = arith.constant 0 : index
    %c0_5 = arith.constant 0 : index
    %5 = vector.load %arg3[%c0_3, %c0_4, %c0_5] : memref<1x256x64xbf16, #tpu.memory_space<vmem>>, vector<1x256x64xbf16>
    %6 = vector.shape_cast %5 : vector<1x256x64xbf16> to vector<256x64xbf16>
    %cst = arith.constant dense<0.000000e+00> : vector<128x64xf32>
    %7 = tpu.matmul %4, %6, %cst {dimension_numbers = #tpu.dot_dimension_numbers<[1], [0], [0], [1], [0, 0, 1, 1], [], []>} : vector<128x256xbf16>, vector<256x64xbf16>, vector<128x64xf32> -> vector<128x64xf32>
    %c0_6 = arith.constant 0 : index
    %c0_7 = arith.constant 0 : index
    %c0_8 = arith.constant 0 : index
    %8 = vector.load %arg4[%c0_6, %c0_7, %c0_8] : memref<1x1x64xf32, #tpu.memory_space<vmem>>, vector<1x1x64xf32>
    %9 = vector.shape_cast %8 : vector<1x1x64xf32> to vector<1x64xf32>
    %10 = vector.broadcast %9 : vector<1x64xf32> to vector<128x64xf32>
    %11 = arith.addf %7, %10 : vector<128x64xf32>
    %c0_9 = arith.constant 0 : index
    %c0_10 = arith.constant 0 : index
    %c0_11 = arith.constant 0 : index
    %12 = vector.load %arg5[%c0_9, %c0_10, %c0_11] : memref<1x256x64xbf16, #tpu.memory_space<vmem>>, vector<1x256x64xbf16>
    %13 = vector.shape_cast %12 : vector<1x256x64xbf16> to vector<256x64xbf16>
    %cst_12 = arith.constant dense<0.000000e+00> : vector<128x64xf32>
    %14 = tpu.matmul %4, %13, %cst_12 {dimension_numbers = #tpu.dot_dimension_numbers<[1], [0], [0], [1], [0, 0, 1, 1], [], []>} : vector<128x256xbf16>, vector<256x64xbf16>, vector<128x64xf32> -> vector<128x64xf32>
    %c0_13 = arith.constant 0 : index
    %c0_14 = arith.constant 0 : index
    %c0_15 = arith.constant 0 : index
    %15 = vector.load %arg6[%c0_13, %c0_14, %c0_15] : memref<1x256x64xbf16, #tpu.memory_space<vmem>>, vector<1x256x64xbf16>
    %16 = vector.shape_cast %15 : vector<1x256x64xbf16> to vector<256x64xbf16>
    %cst_16 = arith.constant dense<0.000000e+00> : vector<128x64xf32>
    %17 = tpu.matmul %4, %16, %cst_16 {dimension_numbers = #tpu.dot_dimension_numbers<[1], [0], [0], [1], [0, 0, 1, 1], [], []>} : vector<128x256xbf16>, vector<256x64xbf16>, vector<128x64xf32> -> vector<128x64xf32>
    %18 = tpu.iota {dimensions = array<i32: 0>} : vector<64x64xi32>
    %19 = tpu.iota {dimensions = array<i32: 1>} : vector<64x64xi32>
    %c1_i32 = arith.constant 1 : i32
    %20 = vector.broadcast %c1_i32 : i32 to vector<64x64xi32>
    %21 = arith.addi %18, %20 : vector<64x64xi32>
    %22 = arith.cmpi eq, %19, %21 : vector<64x64xi32>
    %c2_i32 = arith.constant 2 : i32
    %c0_i32_17 = arith.constant 0 : i32
    %23 = arith.cmpi eq, %c2_i32, %c0_i32_17 : i32
    %c1_i32_18 = arith.constant 1 : i32
    %24 = arith.select %23, %c1_i32_18, %c2_i32 : i32
    %25 = vector.broadcast %24 : i32 to vector<64x64xi32>
    %26 = arith.remsi %18, %25 : vector<64x64xi32>
    %c0_i32_19 = arith.constant 0 : i32
    %27 = vector.broadcast %c0_i32_19 : i32 to vector<64x64xi32>
    %28 = arith.cmpi ne, %26, %27 : vector<64x64xi32>
    %c0_i32_20 = arith.constant 0 : i32
    %29 = vector.broadcast %c0_i32_20 : i32 to vector<64x64xi32>
    %30 = arith.cmpi slt, %26, %29 : vector<64x64xi32>
    %c0_i32_21 = arith.constant 0 : i32
    %31 = arith.cmpi slt, %24, %c0_i32_21 : i32
    %32 = vector.broadcast %31 : i1 to vector<64x64xi1>
    %33 = vector.broadcast %32 : vector<64x64xi1> to vector<64x64xi1>
    %34 = arith.xori %30, %33 : vector<64x64xi1>
    %35 = arith.andi %34, %28 : vector<64x64xi1>
    %36 = vector.broadcast %24 : i32 to vector<64x64xi32>
    %37 = arith.addi %26, %36 : vector<64x64xi32>
    %38 = arith.select %35, %37, %26 : vector<64x64xi1>, vector<64x64xi32>
    %c0_i32_22 = arith.constant 0 : i32
    %39 = vector.broadcast %c0_i32_22 : i32 to vector<64x64xi32>
    %40 = arith.cmpi eq, %38, %39 : vector<64x64xi32>
    %41 = arith.andi %22, %40 : vector<64x64xi1>
    %cst_23 = arith.constant 1.000000e+00 : f32
    %cst_24 = arith.constant 0.000000e+00 : f32
    %42 = vector.broadcast %cst_23 : f32 to vector<64x64xf32>
    %43 = vector.broadcast %cst_24 : f32 to vector<64x64xf32>
    %44 = arith.select %41, %42, %43 : vector<64x64xi1>, vector<64x64xf32>
    %c1_i32_25 = arith.constant 1 : i32
    %45 = vector.broadcast %c1_i32_25 : i32 to vector<64x64xi32>
    %46 = arith.subi %18, %45 : vector<64x64xi32>
    %47 = arith.cmpi eq, %19, %46 : vector<64x64xi32>
    %c2_i32_26 = arith.constant 2 : i32
    %c0_i32_27 = arith.constant 0 : i32
    %48 = arith.cmpi eq, %c2_i32_26, %c0_i32_27 : i32
    %c1_i32_28 = arith.constant 1 : i32
    %49 = arith.select %48, %c1_i32_28, %c2_i32_26 : i32
    %50 = vector.broadcast %49 : i32 to vector<64x64xi32>
    %51 = arith.remsi %18, %50 : vector<64x64xi32>
    %c0_i32_29 = arith.constant 0 : i32
    %52 = vector.broadcast %c0_i32_29 : i32 to vector<64x64xi32>
    %53 = arith.cmpi ne, %51, %52 : vector<64x64xi32>
    %c0_i32_30 = arith.constant 0 : i32
    %54 = vector.broadcast %c0_i32_30 : i32 to vector<64x64xi32>
    %55 = arith.cmpi slt, %51, %54 : vector<64x64xi32>
    %c0_i32_31 = arith.constant 0 : i32
    %56 = arith.cmpi slt, %49, %c0_i32_31 : i32
    %57 = vector.broadcast %56 : i1 to vector<64x64xi1>
    %58 = vector.broadcast %57 : vector<64x64xi1> to vector<64x64xi1>
    %59 = arith.xori %55, %58 : vector<64x64xi1>
    %60 = arith.andi %59, %53 : vector<64x64xi1>
    %61 = vector.broadcast %49 : i32 to vector<64x64xi32>
    %62 = arith.addi %51, %61 : vector<64x64xi32>
    %63 = arith.select %60, %62, %51 : vector<64x64xi1>, vector<64x64xi32>
    %c1_i32_32 = arith.constant 1 : i32
    %64 = vector.broadcast %c1_i32_32 : i32 to vector<64x64xi32>
    %65 = arith.cmpi eq, %63, %64 : vector<64x64xi32>
    %66 = arith.andi %47, %65 : vector<64x64xi1>
    %cst_33 = arith.constant -1.000000e+00 : f32
    %cst_34 = arith.constant 0.000000e+00 : f32
    %67 = vector.broadcast %cst_33 : f32 to vector<64x64xf32>
    %68 = vector.broadcast %cst_34 : f32 to vector<64x64xf32>
    %69 = arith.select %66, %67, %68 : vector<64x64xi1>, vector<64x64xf32>
    %70 = arith.addf %44, %69 : vector<64x64xf32>
    %c0_35 = arith.constant 0 : index
    %c0_36 = arith.constant 0 : index
    %71 = vector.load %arg8[%c0_35, %c0_36] : memref<128x64xf32, #tpu.memory_space<vmem>>, vector<128x64xf32>
    %c0_37 = arith.constant 0 : index
    %c0_38 = arith.constant 0 : index
    %72 = vector.load %arg9[%c0_37, %c0_38] : memref<128x64xf32, #tpu.memory_space<vmem>>, vector<128x64xf32>
    %73 = arith.mulf %11, %71 : vector<128x64xf32>
    %cst_39 = arith.constant dense<0.000000e+00> : vector<128x64xf32>
    %74 = tpu.matmul %11, %70, %cst_39 {dimension_numbers = #tpu.dot_dimension_numbers<[1], [0], [0], [1], [0, 0, 1, 1], [], []>} : vector<128x64xf32>, vector<64x64xf32>, vector<128x64xf32> -> vector<128x64xf32>
    %75 = arith.mulf %74, %72 : vector<128x64xf32>
    %76 = arith.addf %73, %75 : vector<128x64xf32>
    %77 = arith.mulf %14, %71 : vector<128x64xf32>
    %cst_40 = arith.constant dense<0.000000e+00> : vector<128x64xf32>
    %78 = tpu.matmul %14, %70, %cst_40 {dimension_numbers = #tpu.dot_dimension_numbers<[1], [0], [0], [1], [0, 0, 1, 1], [], []>} : vector<128x64xf32>, vector<64x64xf32>, vector<128x64xf32> -> vector<128x64xf32>
    %79 = arith.mulf %78, %72 : vector<128x64xf32>
    %80 = arith.addf %77, %79 : vector<128x64xf32>
    %81 = arith.truncf %76 : vector<128x64xf32> to vector<128x64xbf16>
    %82 = arith.truncf %80 : vector<128x64xf32> to vector<128x64xbf16>
    %cst_41 = arith.constant dense<0.000000e+00> : vector<128x128xf32>
    %83 = tpu.matmul %81, %82, %cst_41 {dimension_numbers = #tpu.dot_dimension_numbers<[1], [1], [0], [0], [0, 0, 1, 0], [], []>} : vector<128x64xbf16>, vector<128x64xbf16>, vector<128x128xf32> -> vector<128x128xf32>
    %84 = tpu.iota {dimensions = array<i32: 0>} : vector<128x128xi32>
    %85 = tpu.iota {dimensions = array<i32: 1>} : vector<128x128xi32>
    %86 = arith.cmpi sle, %85, %84 : vector<128x128xi32>
    %cst_42 = arith.constant -1.000000e+30 : f32
    %87 = vector.broadcast %cst_42 : f32 to vector<128x128xf32>
    %88 = arith.select %86, %83, %87 : vector<128x128xi1>, vector<128x128xf32>
    %cst_43 = arith.constant dense<0xFF800000> : vector<128xf32>
    %89 = vector.multi_reduction <maximumf>, %88, %cst_43 [1] : vector<128x128xf32> to vector<128xf32>
    %90 = vector.shape_cast %89 : vector<128xf32> to vector<128x1xf32>
    %91 = vector.broadcast %90 : vector<128x1xf32> to vector<128x128xf32>
    %92 = arith.subf %88, %91 : vector<128x128xf32>
    %93 = math.exp %92 : vector<128x128xf32>
    %cst_44 = arith.constant dense<0.000000e+00> : vector<128xf32>
    %94 = vector.multi_reduction <add>, %93, %cst_44 [1] : vector<128x128xf32> to vector<128xf32>
    %95 = vector.shape_cast %94 : vector<128xf32> to vector<128x1xf32>
    %96 = arith.truncf %93 : vector<128x128xf32> to vector<128x128xbf16>
    %97 = arith.truncf %17 : vector<128x64xf32> to vector<128x64xbf16>
    %cst_45 = arith.constant dense<0.000000e+00> : vector<128x64xf32>
    %98 = tpu.matmul %96, %97, %cst_45 {dimension_numbers = #tpu.dot_dimension_numbers<[1], [0], [0], [1], [0, 0, 1, 1], [], []>} : vector<128x128xbf16>, vector<128x64xbf16>, vector<128x64xf32> -> vector<128x64xf32>
    %99 = tpu.reciprocal %95 {approx = true} : vector<128x1xf32> -> vector<128x1xf32>
    %100 = vector.broadcast %99 : vector<128x1xf32> to vector<128x64xf32>
    %101 = arith.mulf %98, %100 : vector<128x64xf32>
    %c0_46 = arith.constant 0 : index
    %c0_47 = arith.constant 0 : index
    %102 = vector.load %arg11[%c0_46, %c0_47] : memref<128x256xf32, #tpu.memory_space<vmem>>, vector<128x256xf32>
    %103 = arith.truncf %101 : vector<128x64xf32> to vector<128x64xbf16>
    %c0_48 = arith.constant 0 : index
    %c0_49 = arith.constant 0 : index
    %c0_50 = arith.constant 0 : index
    %104 = vector.load %arg7[%c0_48, %c0_49, %c0_50] : memref<1x64x256xbf16, #tpu.memory_space<vmem>>, vector<1x64x256xbf16>
    %105 = vector.shape_cast %104 : vector<1x64x256xbf16> to vector<64x256xbf16>
    %cst_51 = arith.constant dense<0.000000e+00> : vector<128x256xf32>
    %106 = tpu.matmul %103, %105, %cst_51 {dimension_numbers = #tpu.dot_dimension_numbers<[1], [0], [0], [1], [0, 0, 1, 1], [], []>} : vector<128x64xbf16>, vector<64x256xbf16>, vector<128x256xf32> -> vector<128x256xf32>
    %107 = arith.addf %102, %106 : vector<128x256xf32>
    %c0_52 = arith.constant 0 : index
    %c0_53 = arith.constant 0 : index
    %108 = vector.load %arg11[%c0_52, %c0_53] : memref<128x256xf32, #tpu.memory_space<vmem>>, vector<128x256xf32>
    tpu.vector_store %arg11[%c0_52, %c0_53], %107 {strides = array<i32>} : memref<128x256xf32, #tpu.memory_space<vmem>>, vector<128x256xf32>,
    %c3_i32 = arith.constant 3 : i32
    %109 = arith.cmpi eq, %arg1, %c3_i32 : i32
    %110 = arith.extui %109 : i1 to i32
    %c0_i32_54 = arith.constant 0 : i32
    %111 = arith.cmpi ne, %110, %c0_i32_54 : i32
    scf.if %111 {
      %c0_55 = arith.constant 0 : index
      %c0_56 = arith.constant 0 : index
      %112 = vector.load %arg11[%c0_55, %c0_56] : memref<128x256xf32, #tpu.memory_space<vmem>>, vector<128x256xf32>
      %c0_57 = arith.constant 0 : index
      %c0_58 = arith.constant 0 : index
      %c0_59 = arith.constant 0 : index
      %113 = vector.load %arg10[%c0_57, %c0_58, %c0_59] : memref<1x128x256xf32, #tpu.memory_space<vmem>>, vector<1x128x256xf32>
      %114 = vector.shape_cast %113 : vector<1x128x256xf32> to vector<128x256xf32>
      %115 = vector.shape_cast %112 : vector<128x256xf32> to vector<1x128x256xf32>
      tpu.vector_store %arg10[%c0_57, %c0_58, %c0_59], %115 {strides = array<i32>} : memref<1x128x256xf32, #tpu.memory_space<vmem>>, vector<1x128x256xf32>,
    } else {
    }
    return
  }
  func.func @transform_0(%arg0: i32, %arg1: i32) -> (i32, i32, i32) {
    %c0_i32 = arith.constant 0 : i32
    %c0_i32_0 = arith.constant 0 : i32
    %c0_i32_1 = arith.constant 0 : i32
    return %arg0, %c0_i32, %c0_i32_0 : i32, i32, i32
  }
  func.func @transform_1(%arg0: i32, %arg1: i32) -> (i32, i32, i32) {
    %c0_i32 = arith.constant 0 : i32
    %c0_i32_0 = arith.constant 0 : i32
    %c0_i32_1 = arith.constant 0 : i32
    return %arg1, %c0_i32, %c0_i32_0 : i32, i32, i32
  }
  func.func @transform_2(%arg0: i32, %arg1: i32) -> (i32, i32, i32) {
    %c0_i32 = arith.constant 0 : i32
    %c0_i32_0 = arith.constant 0 : i32
    %c0_i32_1 = arith.constant 0 : i32
    return %arg1, %c0_i32, %c0_i32_0 : i32, i32, i32
  }
  func.func @transform_3(%arg0: i32, %arg1: i32) -> (i32, i32, i32) {
    %c0_i32 = arith.constant 0 : i32
    %c0_i32_0 = arith.constant 0 : i32
    %c0_i32_1 = arith.constant 0 : i32
    return %arg1, %c0_i32, %c0_i32_0 : i32, i32, i32
  }
  func.func @transform_4(%arg0: i32, %arg1: i32) -> (i32, i32, i32) {
    %c0_i32 = arith.constant 0 : i32
    %c0_i32_0 = arith.constant 0 : i32
    %c0_i32_1 = arith.constant 0 : i32
    return %arg1, %c0_i32, %c0_i32_0 : i32, i32, i32
  }
  func.func @transform_5(%arg0: i32, %arg1: i32) -> (i32, i32, i32) {
    %c0_i32 = arith.constant 0 : i32
    %c0_i32_0 = arith.constant 0 : i32
    %c0_i32_1 = arith.constant 0 : i32
    return %arg1, %c0_i32, %c0_i32_0 : i32, i32, i32
  }
  func.func @transform_6(%arg0: i32, %arg1: i32) -> (i32, i32) {
    %c0_i32 = arith.constant 0 : i32
    %c0_i32_0 = arith.constant 0 : i32
    %c0_i32_1 = arith.constant 0 : i32
    return %c0_i32, %c0_i32_0 : i32, i32
  }
  func.func @transform_7(%arg0: i32, %arg1: i32) -> (i32, i32) {
    %c0_i32 = arith.constant 0 : i32
    %c0_i32_0 = arith.constant 0 : i32
    %c0_i32_1 = arith.constant 0 : i32
    return %c0_i32, %c0_i32_0 : i32, i32
  }
  func.func @transform_8(%arg0: i32, %arg1: i32) -> (i32, i32, i32) {
    %c0_i32 = arith.constant 0 : i32
    %c0_i32_0 = arith.constant 0 : i32
    %c0_i32_1 = arith.constant 0 : i32
    return %arg0, %c0_i32, %c0_i32_0 : i32, i32, i32
  }
}

</mosaic_0001>

<bundles_post_ra>
// kernel: tpu_custom_call.1
= control target key start
LH: loop header
LB: loop body
LE: loop exit
PB: predicated region body
PF: predicated region fallthrough
CT: control target
= control target key end

     0   :  { %s5060_s0 = inlined_call_operand.vmem [shape: bf16[2,128,256], index: 0, kind: input, shape index: {}]   ;;  %s5061_s1 = inlined_call_operand.vmem [shape: bf16[4,256,64], index: 1, kind: input, shape index: {}]   ;;  %s5062_s2 = inlined_call_operand.vmem [shape: f32[4,1,64], index: 2, kind: input, shape index: {}]   ;;  %s5063_s3 = inlined_call_operand.vmem [shape: bf16[4,256,64], index: 3, kind: input, shape index: {}]   ;;  %s5064_s4 = inlined_call_operand.vmem [shape: bf16[4,256,64], index: 4, kind: input, shape index: {}]   ;;  %s5065_s5 = inlined_call_operand.vmem [shape: bf16[4,64,256], index: 5, kind: input, shape index: {}]   ;;  %s5066_s6 = inlined_call_operand.vmem [shape: f32[128,64], index: 6, kind: input, shape index: {}]   ;;  %s5067_s7 = inlined_call_operand.vmem [shape: f32[128,64], index: 7, kind: input, shape index: {}]   ;;  %s5068_s8 = inlined_call_operand.hbm [shape: f32[2,128,256], index: 8, kind: output, shape index: {}]  }
   0x1   :  { %5097 = sst [smem:[#allocation32_spill]] %s5060_s0 }
   0x2   :  { %13 = vsyncpa [#allocation4], 0 }
   0x3   :  { %15 = vsyncpa [#allocation4 + $0x1], 0  ;;  %s3861_s27 = smov 0   ;;  %s3863_s28 = smov 0  }
   0x4   :  { %s3865_s29 = smov 0   ;;  %s3867_s30 = smov 0  }
   0x5   :  { %s3869_s9 = smov 0   ;;  %s3871_s10 = smov 0  }
   0x6   :  { %s3873_s11 = smov 0   ;;  %s3875_s12 = smov 0  }
   0x7 LB: > { %5098 = sst [smem:[#allocation6_spill]] %s3780_s27  ;;  %s2894_s13 = sadd.s32 4294967295, %s3808_s12   ;;  %s3808_s12 = sphi %s3875_s12, %s21_s12   ;;  %s3804_s11 = sphi %s3873_s11, %s5174_s11   ;;  %s3800_s10 = sphi %s3871_s10, %s5177_s10   ;;  %s3796_s9 = sphi %s3869_s9, %s5172_s9   ;;  %s3792_s30 = sphi %s3867_s30, %s5171_s30   ;;  %s3788_s29 = sphi %s3865_s29, %s5170_s29   ;;  %s3784_s28 = sphi %s3863_s28, %s5176_s28   ;;  %s3780_s27 = sphi %s3861_s27, %s5175_s27  }
   0x8   : > { %5099 = sst [smem:[#allocation7_spill]] %s3788_s29  ;;  %s2895_s14 = sadd.s32 4294967294, %s3808_s12  }
   0x9   : > { %5100 = sst [smem:[#allocation8_spill]] %s3800_s10  ;;  %s30_s15 = sadd.s32 1, %s3800_s10 }
   0xa   : > { %5101 = sst [smem:[#allocation9_spill]] %s3804_s11  ;;  %p31_p0 = scmp.ge.s32.totalorder %s30_s15, 4 }
   0xb   : > { %5102 = sst [smem:[#allocation10_spill]] %s3808_s12  ;;  %s33_s16 = sadd.s32 1, %s3804_s11 }
   0xc   : > { %p248_p1 = scmp.ne.s32.totalorder %s3788_s29, %s3784_s28  ;;  %p249_p2 = scmp.eq.s32.totalorder %s2894_s13, 7 }
   0xd   : > { %s5179_s15 = smov (%p31_p0, %s30_s15), 0  ;;  %s5181_s16 = smov (!%p31_p0, %s33_s16), %s3804_s11 }
   0xe   : > { %5103 = sst [smem:[#allocation11_spill]] %s5179_s15  ;;  %p3910_p3 = por %p249_p2, %p248_p1 }
   0xf   : > { %p254_p4 = scmp.ne.s32.totalorder %s3784_s28, %s3780_s27  ;;  %p35_p5 = scmp.ge.s32.totalorder %s5181_s16, 2 }
  0x10   : > { %p255_p6 = scmp.eq.s32.totalorder %s2895_s14, 7  ;;  %p2898_p7 = scmp.ge.s32.totalorder %s3808_s12, 1 }
  0x11   : > { %p325_p8 = scmp.lt.s32.totalorder %s3808_s12, 9  ;;  %s5183_s16 = smov (%p35_p5, %s5181_s16), 0 }
  0x12   : > { %5105 = sst [smem:[#allocation12_spill]] %s5183_s16  ;;  %p3920_p9 = por %p255_p6, %p254_p4 }
  0x13   : > { %p326_p10 = pnand %p2898_p7, %p325_p8  ;;  %s235_s19 = ssub.s32 %s3804_s11, %s5183_s16 }
  0x14   : > { %s5106_s18 = scalar_select %p3920_p9, 1, 0 }
  0x15   : > { %s238_s20 = sadd.s32 1, %s3788_s29  ;;  %p236_p11 = scmp.eq.s32.totalorder %s235_s19, 0 }
  0x16   : > { %5107 = sst [smem:[#allocation13_spill]] %s5106_s18  ;;  %329 = sbr.rel (%p326_p10) target bundleno = 1509 (0x5e5), region = 52 }
  0x17   : > { %s3928_s21 = scalar_select %p236_p11, %s3788_s29, %s238_s20  }
  0x19   : > { %5108 = sst [smem:[#allocation14_spill]] %s3928_s21 }
  0x1b   : > { %s5071_s22 = sand.u32 1, %s3784_s28   ;;  %p382_p12 = scmp.lt.s32.totalorder %s3796_s9, 1 }
  0x1c   : > { %s2899_s23 = sshll.u32 %s5071_s22, 8  ;;  %p387_p13 = scmp.lt.s32.totalorder %s3792_s30, 3 }
  0x1d   : > { %s383_s24 = scalar_select %p382_p12, %s3796_s9, 1 }
  0x1e   : > { %s3937_s25 = scalar_select %p387_p13, %s3792_s30, 3 }
  0x1f   : > { %s3046_s26 = sshll.u32 %s383_s24, 7  ;;  %s5109_s0 = sld [smem:[#allocation32_spill]] }
  0x20   : > { %s3047_s20 = sshll.u32 %s3937_s25, 7  ;;  %s394_s21 = scalar_lea.vmem %s5062_s2, %s3937_s25 }
  0x21   : > { %s3948_s11 = scalar_lea.vmem %s5061_s1, %s3047_s20  ;;  %s3957_s27 = scalar_lea.vmem %s5063_s3, %s3047_s20 }
  0x22   : > { %s3050_s13 = sshll.u32 %s3937_s25, 6  ;;  %s3970_s16 = scalar_lea.vmem [#allocation3], %s2899_s23 }
  0x23   : > { %s3968_s15 = scalar_lea.vmem %s5065_s5, %s3050_s13  ;;  %p2910_p0 = scmp.ne.s32.totalorder %s3792_s30, 0 }
  0x25   : > { %s3942_s19 = scalar_lea.vmem %s5109_s0, %s3046_s26  ;;  %s3962_s26 = scalar_lea.vmem %s5064_s4, %s3047_s20 }
  0x26   : > { %414 = sbr.rel (%p2910_p0) target bundleno = 60 (0x3c), region = 56 }
  0x2b   : > { %v3810_v0 = vmov 0.0  }
  0x2c   : > { %415 = vst [vmem:[#allocation2 + $0xb0] sm:$0xff] %v3810_v0  ;;  %416 = vst [vmem:[#allocation2] sm:$0xff] %v3810_v0 }
  0x2d   : > { %417 = vst [vmem:[#allocation2 + $0xd8] sm:$0xff] %v3810_v0  ;;  %418 = vst [vmem:[#allocation2 + $0x18] sm:$0xff] %v3810_v0 }
  0x2e   : > { %419 = vst [vmem:[#allocation2 + $0x50] sm:$0xff] %v3810_v0  ;;  %420 = vst [vmem:[#allocation2 + $0x68] sm:$0xff] %v3810_v0 }
  0x2f   : > { %421 = vst [vmem:[#allocation2 + $0x30] sm:$0xff] %v3810_v0  ;;  %422 = vst [vmem:[#allocation2 + $0x48] sm:$0xff] %v3810_v0 }
  0x30   : > { %423 = vst [vmem:[#allocation2 + $0x80] sm:$0xff] %v3810_v0  ;;  %424 = vst [vmem:[#allocation2 + $0x88] sm:$0xff] %v3810_v0 }
  0x31   : > { %425 = vst [vmem:[#allocation2 + $0xe8] sm:$0xff] %v3810_v0  ;;  %426 = vst [vmem:[#allocation2 + $0xb8] sm:$0xff] %v3810_v0 }
  0x32   : > { %427 = vst [vmem:[#allocation2 + $0x60] sm:$0xff] %v3810_v0  ;;  %428 = vst [vmem:[#allocation2 + $0xf0] sm:$0xff] %v3810_v0 }
  0x33   : > { %429 = vst [vmem:[#allocation2 + $0x8] sm:$0xff] %v3810_v0  ;;  %430 = vst [vmem:[#allocation2 + $0x78] sm:$0xff] %v3810_v0 }
  0x34   : > { %431 = vst [vmem:[#allocation2 + $0x38] sm:$0xff] %v3810_v0  ;;  %432 = vst [vmem:[#allocation2 + $0x58] sm:$0xff] %v3810_v0 }
  0x35   : > { %433 = vst [vmem:[#allocation2 + $0x40] sm:$0xff] %v3810_v0  ;;  %434 = vst [vmem:[#allocation2 + $0xc8] sm:$0xff] %v3810_v0 }
  0x36   : > { %435 = vst [vmem:[#allocation2 + $0xe0] sm:$0xff] %v3810_v0  ;;  %436 = vst [vmem:[#allocation2 + $0x90] sm:$0xff] %v3810_v0 }
  0x37   : > { %437 = vst [vmem:[#allocation2 + $0x70] sm:$0xff] %v3810_v0  ;;  %438 = vst [vmem:[#allocation2 + $0xc0] sm:$0xff] %v3810_v0 }
  0x38   : > { %439 = vst [vmem:[#allocation2 + $0xa8] sm:$0xff] %v3810_v0  ;;  %440 = vst [vmem:[#allocation2 + $0xd0] sm:$0xff] %v3810_v0 }
  0x39   : > { %441 = vst [vmem:[#allocation2 + $0x10] sm:$0xff] %v3810_v0  ;;  %442 = vst [vmem:[#allocation2 + $0x28] sm:$0xff] %v3810_v0 }
  0x3a   : > { %443 = vst [vmem:[#allocation2 + $0xa0] sm:$0xff] %v3810_v0  ;;  %444 = vst [vmem:[#allocation2 + $0xf8] sm:$0xff] %v3810_v0 }
  0x3b   : > { %445 = vst [vmem:[#allocation2 + $0x20] sm:$0xff] %v3810_v0  ;;  %446 = vst [vmem:[#allocation2 + $0x98] sm:$0xff] %v3810_v0 }
  0x3c PF: > { %v3568_v1 = vld [vmem:[%s3948_s11 + $0x78] sm:$0xff]   ;;  %v3570_v3 = vld [vmem:[%s3948_s11 + $0x70] sm:$0xff]   ;;  %v3572_v5 = vld [vmem:[%s3948_s11 + $0x68] sm:$0xff]   ;;  %v1225_v18 = vlaneseq  ;;  %p3040_p1 = scmp.ne.s32.totalorder %s3792_s30, 3 }
  0x3d   : > { %v3569_v2 = vld [vmem:[%s3948_s11 + $0x38] sm:$0xff]   ;;  %3052 = vmatprep.subr.bf16.mxu0 %v3568_v1  ;;  %3468 = vmatprep.subr.bf16.mxu1 %v3568_v1  ;;  %v3571_v4 = vld [vmem:[%s3948_s11 + $0x30] sm:$0xff]   ;;  %v3573_v6 = vld [vmem:[%s3948_s11 + $0x28] sm:$0xff]  }
  0x3e   : > { %3053 = vmatpush3.bf16.msra.mxu0 %v3569_v2  ;;  %3476 = vmatpush3.bf16.msra.mxu1 %v3569_v2  ;;  %v3574_v7 = vld [vmem:[%s3948_s11 + $0x60] sm:$0xff]   ;;  %v3576_v9 = vld [vmem:[%s3948_s11 + $0x58] sm:$0xff]   ;;  %v3578_v11 = vld [vmem:[%s3948_s11 + $0x50] sm:$0xff]   ;;  %v4001_v22 = vshrl.u32 %v1225_v18, 7  ;;  %v4032_v34 = vand.u32 127, %v1225_v18 }
  0x3f   : > { %3054 = vmatprep.subr.bf16.mxu0 %v3570_v3  ;;  %3469 = vmatprep.subr.bf16.mxu1 %v3570_v3  ;;  %v3575_v8 = vld [vmem:[%s3948_s11 + $0x20] sm:$0xff]   ;;  %v3577_v10 = vld [vmem:[%s3948_s11 + $0x18] sm:$0xff]   ;;  %v3579_v14 = vld [vmem:[%s3948_s11 + $0x10] sm:$0xff]  }
  0x40   : > { %v3985_v12 = vld [vmem:[%s3942_s19 + $0x4] ss:$8 sps:$4 sm:$0xff]   ;;  %v3590_v20 = vld [vmem:[%s3957_s27 + $0x78] sm:$0xff]   ;;  %v3999_v21 = vld [vmem:[%s3942_s19] ss:$8 sps:$4 sm:$0xff]   ;;  %5110 = vst [vmem:[#allocation15_spill] sm:$0xff] %v4001_v22 }
  0x41   : > { %v3988_v13 = vld [vmem:[%s3942_s19 + $0x44] ss:$8 sps:$4 sm:$0xff]   ;;  %710 = vmatprep.mubr.bf16.mxu0 %v3985_v12  ;;  %v4004_v23 = vld [vmem:[%s3942_s19 + $0x40] ss:$8 sps:$4 sm:$0xff]   ;;  %v3591_v24 = vld [vmem:[%s3957_s27 + $0x38] sm:$0xff]   ;;  %v4015_v28 = vadd.s32 56, %v4001_v22 }
  0x42   : > { %3055 = vmatpush3.bf16.msra.mxu0 %v3571_v4  ;;  %3477 = vmatpush3.bf16.msra.mxu1 %v3571_v4  ;;  %v3580_v15 = vld [vmem:[%s3948_s11 + $0x48] sm:$0xff]   ;;  %v3582_v17 = vld [vmem:[%s3948_s11 + $0x40] sm:$0xff]   ;;  %v3592_v25 = vld [vmem:[%s3957_s27 + $0x70] sm:$0xff]   ;;  %v4020_v29 = vadd.s32 48, %v4001_v22  ;;  %5113 = vst [vmem:[#allocation18_spill] sm:$0xff] %v4032_v34  ;;  %v4047_v43 = vadd.s32 40, %v4001_v22 }
  0x43   : > { %3056 = vmatprep.subr.bf16.mxu0 %v3572_v5  ;;  %3470 = vmatprep.subr.bf16.mxu1 %v3572_v5  ;;  %v3581_v16 = vld [vmem:[%s3948_s11 + $0x8] sm:$0xff]   ;;  %v3583_v19 = vld [vmem:[%s3948_s11] sm:$0xff]   ;;  %v4009_v26 = vld [vmem:[%s3942_s19 + $0x14] ss:$8 sps:$4 sm:$0xff]   ;;  %5111 = vst [vmem:[#allocation16_spill] sm:$0xff] %v4015_v28  ;;  %v1243_v35 = vadd.s32 1, %v4015_v28 }
  0x44   : > { %742 = vmatprep.mubr.bf16.mxu1 %v3988_v13  ;;  %v4012_v27 = vld [vmem:[%s3942_s19 + $0x54] ss:$8 sps:$4 sm:$0xff]   ;;  %5112 = vst [vmem:[#allocation17_spill] sm:$0xff] %v4020_v29  ;;  %v4026_v31 = vld [vmem:[%s3942_s19 + $0x10] ss:$8 sps:$4 sm:$0xff]   ;;  %v3600_v32 = vld [vmem:[%s3957_s27 + $0x68] sm:$0xff]  }
  0x45   : > { %v3593_v30 = vld [vmem:[%s3957_s27 + $0x30] sm:$0xff]   ;;  %v3601_v36 = vld [vmem:[%s3957_s27 + $0x28] sm:$0xff]   ;;  %v3602_v37 = vld [vmem:[%s3957_s27 + $0x60] sm:$0xff]   ;;  %v1305_v38 = vand.u32 1, %v4015_v28  ;;  %v1298_v39 = vand.u32 1, %v4020_v29  ;;  %v2983_v42 = vadd.s32 4294967295, %v4015_v28  ;;  %vm1251_vm3 = vcmp.eq.s32.totalorder %v4032_v34, %v1243_v35 }
  0x46   : > { %3057 = vmatpush3.bf16.msra.mxu0 %v3573_v6  ;;  %3478 = vmatpush3.bf16.msra.mxu1 %v3573_v6  ;;  %v4030_v33 = vld [vmem:[%s3942_s19 + $0x50] ss:$8 sps:$4 sm:$0xff]   ;;  %v4040_v40 = vld [vmem:[%s3942_s19 + $0x24] ss:$8 sps:$4 sm:$0xff]   ;;  %5114 = vst [vmem:[#allocation19_spill] sm:$0xff] %v4047_v43  ;;  %v1242_v46 = vadd.s32 1, %v4020_v29 }
  0x47   : > { %3058 = vmatprep.subr.bf16.mxu0 %v3574_v7  ;;  %3471 = vmatprep.subr.bf16.mxu1 %v3574_v7  ;;  %v4043_v41 = vld [vmem:[%s3942_s19 + $0x64] ss:$8 sps:$4 sm:$0xff]   ;;  %vm4051_vm0 = vcmp.eq.s32.totalorder %v1305_v38, 0  ;;  %vm4055_vm1 = vcmp.eq.s32.totalorder %v1305_v38, 1  ;;  %v2982_v47 = vadd.s32 4294967295, %v4020_v29  ;;  %vm4063_vm2 = vcmp.eq.s32.totalorder %v1298_v39, 0 }
  0x48   : > { %v3603_v48 = vld [vmem:[%s3957_s27 + $0x20] sm:$0xff]   ;;  %v3610_v52 = vld [vmem:[%s3957_s27 + $0x58] sm:$0xff]   ;;  %v4076_v53 = vadd.s32 32, %v4001_v22  ;;  %v1241_v55 = vadd.s32 1, %v4047_v43  ;;  %v3612_v56 = vld [vmem:[%s3957_s27 + $0x50] sm:$0xff]   ;;  %vm1387_vm4 = vcmp.eq.s32.totalorder %v4032_v34, %v2983_v42  ;;  %vm1250_vm5 = vcmp.eq.s32.totalorder %v4032_v34, %v1242_v46 }
  0x49   : > { %v4069_v50 = vld [vmem:[%s3942_s19 + $0x20] ss:$8 sps:$4 sm:$0xff]   ;;  %v3611_v54 = vld [vmem:[%s3957_s27 + $0x18] sm:$0xff]   ;;  %vm4090_vm6 = vcmp.eq.s32.totalorder %v1298_v39, 1  ;;  %vm4096_vm7 = vmand %vm1251_vm3, %vm4051_vm0  ;;  %v1291_v61 = vand.u32 1, %v4047_v43  ;;  %v2981_v62 = vadd.s32 4294967295, %v4047_v43  ;;  %vm1386_vm10 = vcmp.eq.s32.totalorder %v4032_v34, %v2982_v47 }
  0x4a   : > { %3059 = vmatpush3.bf16.msra.mxu0 %v3575_v8  ;;  %3479 = vmatpush3.bf16.msra.mxu1 %v3575_v8  ;;  %v4072_v51 = vld [vmem:[%s3942_s19 + $0x60] ss:$8 sps:$4 sm:$0xff]   ;;  %5121 = vst [vmem:[#allocation20_spill] sm:$0xff] %v4076_v53  ;;  %v4083_v57 = vld [vmem:[%s3942_s19 + $0x34] ss:$8 sps:$4 sm:$0xff]   ;;  %vm4105_vm8 = vmand %vm1387_vm4, %vm4055_vm1  ;;  %v1240_v1 = vadd.s32 1, %v4076_v53  ;;  %vm1249_vm11 = vcmp.eq.s32.totalorder %v4032_v34, %v1241_v55 }
  0x4b   : > { %3060 = vmatprep.subr.bf16.mxu0 %v3576_v9  ;;  %3472 = vmatprep.subr.bf16.mxu1 %v3576_v9  ;;  %v4087_v58 = vld [vmem:[%s3942_s19 + $0x74] ss:$8 sps:$4 sm:$0xff]   ;;  %v1284_v2 = vand.u32 1, %v4076_v53  ;;  %v3620_v3 = vld [vmem:[%s3957_s27 + $0x48] sm:$0xff]   ;;  %vm4116_vm9 = vmand %vm1250_vm5, %vm4063_vm2  ;;  %v2980_v5 = vadd.s32 4294967295, %v4076_v53  ;;  %vm1353_vm12 = vcmp.eq.s32.totalorder %v1291_v61, 0  ;;  %vm1385_vm13 = vcmp.eq.s32.totalorder %v4032_v34, %v2981_v62 }
  0x4c   : > { %v3613_v63 = vld [vmem:[%s3957_s27 + $0x10] sm:$0xff]   ;;  %v3621_v8 = vld [vmem:[%s3957_s27 + $0x8] sm:$0xff]   ;;  %v3622_v9 = vld [vmem:[%s3957_s27 + $0x40] sm:$0xff]   ;;  %vm1393_vm14 = vcmp.eq.s32.totalorder %v1291_v61, 1  ;;  %vm1248_vm0 = vcmp.eq.s32.totalorder %v4032_v34, %v1240_v1  ;;  %v4186_v35 = vadd.s32 24, %v4001_v22  ;;  %v4192_v39 = vadd.s32 16, %v4001_v22 }
  0x4d   : > { %v4124_v6 = vld [vmem:[%s3942_s19 + $0x30] ss:$8 sps:$4 sm:$0xff]   ;;  %vm1402_vm15 = vmand %vm1386_vm10, %vm4090_vm6  ;;  %vm1352_vm1 = vcmp.eq.s32.totalorder %v1284_v2, 0  ;;  %vm1384_vm3 = vcmp.eq.s32.totalorder %v4032_v34, %v2980_v5  ;;  %vm1392_vm4 = vcmp.eq.s32.totalorder %v1284_v2, 1  ;;  %v4200_v46 = vadd.s32 8, %v4001_v22  ;;  %v4619_v28 = vld [vmem:[%s5067_s7 + $0x48] sm:$0xff] }
  0x4e   : > { %3061 = vmatpush3.bf16.msra.mxu0 %v3577_v10  ;;  %3480 = vmatpush3.bf16.msra.mxu1 %v3577_v10  ;;  %v4127_v7 = vld [vmem:[%s3942_s19 + $0x70] ss:$8 sps:$4 sm:$0xff]   ;;  %v3811_v10 = vmov 0.0   ;;  %vm1361_vm2 = vmand %vm1249_vm11, %vm1353_vm12  ;;  %5130 = vst [vmem:[#allocation21_spill] sm:$0xff] %v4186_v35  ;;  %v2979_v38 = vadd.s32 4294967295, %v4186_v35  ;;  %v1238_v42 = vadd.s32 1, %v4192_v39 }
  0x4f   : > { %3062 = vmatprep.subr.bf16.mxu0 %v3578_v11  ;;  %3473 = vmatprep.subr.bf16.mxu1 %v3578_v11  ;;  %v1371_v11 = vsel %vm4096_vm7, 1.0, %v3811_v10  ;;  %vm1401_vm5 = vmand %vm1385_vm13, %vm1393_vm14  ;;  %v1410_v18 = vsel %vm1402_vm15, -1.0, %v3811_v10  ;;  %5131 = vst [vmem:[#allocation22_spill] sm:$0xff] %v4192_v39  ;;  %v1270_v44 = vand.u32 1, %v4192_v39  ;;  %v2978_v45 = vadd.s32 4294967295, %v4192_v39 }
  0x50   : > { %vm1360_vm6 = vmand %vm1248_vm0, %vm1352_vm1  ;;  %vm1383_vm10 = vcmp.eq.s32.totalorder %v4032_v34, %v2979_v38  ;;  %5132 = vst [vmem:[#allocation23_spill] sm:$0xff] %v4200_v46  ;;  %vm1246_vm14 = vcmp.eq.s32.totalorder %v4032_v34, %v1238_v42  ;;  %v1236_v59 = vadd.s32 1, %v4001_v22  ;;  %v1256_v60 = vand.u32 1, %v4001_v22  ;;  %v3638_v38 = vld [vmem:[%s3962_s26 + $0x40] sm:$0xff]  }
  0x51   : > { %vm1400_vm7 = vmand %vm1384_vm3, %vm1392_vm4  ;;  %vm1350_vm15 = vcmp.eq.s32.totalorder %v1270_v44, 0  ;;  %vm1382_vm0 = vcmp.eq.s32.totalorder %v4032_v34, %v2978_v45  ;;  %v2976_v0 = vadd.s32 4294967295, %v4001_v22  ;;  %v3639_v42 = vld [vmem:[%s3962_s26] sm:$0xff]  }
  0x52   : > { %3063 = vmatpush3.bf16.msra.mxu0 %v3579_v14  ;;  %3481 = vmatpush3.bf16.msra.mxu1 %v3579_v14  ;;  %v1411_v14 = vsel %vm4105_vm8, -1.0, %v3811_v10  ;;  %vm1358_vm1 = vmand %vm1246_vm14, %vm1350_vm15 }
  0x53   : > { %3064 = vmatprep.subr.bf16.mxu0 %v3580_v15  ;;  %3474 = vmatprep.subr.bf16.mxu1 %v3580_v15  ;;  %v3623_v15 = vld [vmem:[%s3957_s27] sm:$0xff]   ;;  %v1366_v55 = vsel %vm1358_vm1, 1.0, %v3811_v10  ;;  %vm1380_vm14 = vcmp.eq.s32.totalorder %v4032_v34, %v2976_v0 }
  0x56   : > { %3065 = vmatpush3.bf16.msra.mxu0 %v3581_v16  ;;  %3482 = vmatpush3.bf16.msra.mxu1 %v3581_v16  ;;  %v4150_v16 = vadd.f32 %v1411_v14, %v1371_v11  ;;  %v3627_v11 = vld [vmem:[%s3962_s26 + $0x30] sm:$0xff]   ;;  %v3628_v14 = vld [vmem:[%s3962_s26 + $0x68] sm:$0xff]  }
  0x57   : > { %3066 = vmatprep.subr.bf16.mxu0 %v3582_v17  ;;  %3475 = vmatprep.subr.bf16.mxu1 %v3582_v17  ;;  %v1370_v17 = vsel %vm4116_vm9, 1.0, %v3811_v10 }
  0x5a   : > { %3067 = vmatpush3.bf16.msra.mxu0 %v3583_v19  ;;  %3483 = vmatpush3.bf16.msra.mxu1 %v3583_v19  ;;  %v1369_v19 = vsel %vm1361_vm2, 1.0, %v3811_v10  ;;  %vm1390_vm2 = vcmp.eq.s32.totalorder %v1270_v44, 1 }
  0x5b   : > { %3116 = vmatprep.subr.bf16.mxu1 %v3590_v20  ;;  %v1409_v20 = vsel %vm1401_vm5, -1.0, %v3811_v10  ;;  %vm1398_vm3 = vmand %vm1382_vm0, %vm1390_vm2  ;;  %vm1468_vm0 = vcmask 523264  }
  0x5c   : > { %v1406_v61 = vsel %vm1398_vm3, -1.0, %v3811_v10 }
  0x5d   : > { %711 = vmatmul.mubr.bf16.vlgmr.msra.gmra.mxu0 %v3999_v21  ;;  %743 = vmatmul.mubr.bf16.vlgmr.msra.gmra.mxu1 %v4004_v23  ;;  %v4220_v62 = vadd.f32 %v1406_v61, %v1366_v55 }
  0x5e   : > { %3117 = vmatpush3.bf16.msra.mxu1 %v3591_v24  ;;  %718 = vmatprep.mubr.bf16.mxu0 %v4009_v26  ;;  %v4162_v24 = vadd.f32 %v1410_v18, %v1370_v17  ;;  %v3630_v17 = vld [vmem:[%s3962_s26 + $0x60] sm:$0xff]  }
  0x5f   : > { %3118 = vmatprep.subr.bf16.mxu1 %v3592_v25  ;;  %750 = vmatprep.mubr.bf16.mxu1 %v4012_v27  ;;  %v1368_v25 = vsel %vm1360_vm6, 1.0, %v3811_v10  ;;  %v3631_v18 = vld [vmem:[%s3962_s26 + $0x20] sm:$0xff]  }
  0x62   : > { %3119 = vmatpush3.bf16.msra.mxu1 %v3593_v30  ;;  %v4167_v30 = vadd.f32 %v1409_v20, %v1369_v19  ;;  %v3632_v19 = vld [vmem:[%s3962_s26 + $0x58] sm:$0xff]  }
  0x63   : > { %3120 = vmatprep.subr.bf16.mxu1 %v3600_v32  ;;  %v3633_v20 = vld [vmem:[%s3962_s26 + $0x18] sm:$0xff]  }
  0x65   : > { %719 = vmatmul.mubr.bf16.gmra.mxu0 %v4026_v31  ;;  %751 = vmatmul.mubr.bf16.gmra.mxu1 %v4030_v33 }
  0x66   : > { %3121 = vmatpush3.bf16.msra.mxu1 %v3601_v36  ;;  %726 = vmatprep.mubr.bf16.mxu0 %v4040_v40  ;;  %v1239_v36 = vadd.s32 1, %v4186_v35 }
  0x67   : > { %3122 = vmatprep.subr.bf16.mxu1 %v3602_v37  ;;  %758 = vmatprep.mubr.bf16.mxu1 %v4043_v41  ;;  %v1277_v37 = vand.u32 1, %v4186_v35 }
  0x68   : > { %vm1247_vm8 = vcmp.eq.s32.totalorder %v4032_v34, %v1239_v36  ;;  %v3636_v36 = vld [vmem:[%s3962_s26 + $0x48] sm:$0xff]  }
  0x69   : > { %vm1351_vm9 = vcmp.eq.s32.totalorder %v1277_v37, 0  ;;  %vm1391_vm11 = vcmp.eq.s32.totalorder %v1277_v37, 1  ;;  %v3637_v37 = vld [vmem:[%s3962_s26 + $0x8] sm:$0xff]  }
  0x6a   : > { %3123 = vmatpush3.bf16.msra.mxu1 %v3603_v48  ;;  %vm1359_vm12 = vmand %vm1247_vm8, %vm1351_vm9  ;;  %vm1244_vm9 = vcmp.eq.s32.totalorder %v4032_v34, %v1236_v59 }
  0x6b   : > { %3124 = vmatprep.subr.bf16.mxu1 %v3610_v52  ;;  %v1367_v47 = vsel %vm1359_vm12, 1.0, %v3811_v10  ;;  %vm1399_vm13 = vmand %vm1383_vm10, %vm1391_vm11  ;;  %v1237_v52 = vadd.s32 1, %v4200_v46  ;;  %vm1348_vm10 = vcmp.eq.s32.totalorder %v1256_v60, 0  ;;  %vm1388_vm12 = vcmp.eq.s32.totalorder %v1256_v60, 1 }
  0x6c   : > { %v1407_v48 = vsel %vm1399_vm13, -1.0, %v3811_v10  ;;  %vm1356_vm13 = vmand %vm1244_vm9, %vm1348_vm10 }
  0x6d   : > { %727 = vmatmul.mubr.bf16.gmra.mxu0 %v4069_v50  ;;  %759 = vmatmul.mubr.bf16.gmra.mxu1 %v4072_v51  ;;  %v4208_v49 = vadd.f32 %v1407_v48, %v1367_v47  ;;  %vm1245_vm4 = vcmp.eq.s32.totalorder %v4032_v34, %v1237_v52  ;;  %vm1396_vm15 = vmand %vm1380_vm14, %vm1388_vm12 }
  0x6e   : > { %3125 = vmatpush3.bf16.msra.mxu1 %v3611_v54  ;;  %734 = vmatprep.mubr.bf16.mxu0 %v4083_v57  ;;  %v1263_v54 = vand.u32 1, %v4200_v46  ;;  %v1404_v4 = vsel %vm1396_vm15, -1.0, %v3811_v10 }
  0x6f   : > { %3126 = vmatprep.subr.bf16.mxu1 %v3612_v56  ;;  %766 = vmatprep.mubr.bf16.mxu1 %v4087_v58  ;;  %v2977_v56 = vadd.s32 4294967295, %v4200_v46  ;;  %v4634_v46 = vld [vmem:[%s5067_s7 + $0x40] sm:$0xff] }
  0x70   : > { %vm1349_vm5 = vcmp.eq.s32.totalorder %v1263_v54, 0  ;;  %vm1389_vm6 = vcmp.eq.s32.totalorder %v1263_v54, 1  ;;  %v4272_v54 = vld [vmem:[%s394_s21] ss:$0 sm:$0xff] }
  0x71   : > { %vm1381_vm8 = vcmp.eq.s32.totalorder %v4032_v34, %v2977_v56 }
  0x72   : > { %3127 = vmatpush3.bf16.msra.mxu1 %v3613_v63  ;;  %vm1397_vm11 = vmand %vm1381_vm8, %vm1389_vm6 }
  0x73   : > { %3128 = vmatprep.subr.bf16.mxu1 %v3620_v3  ;;  %v1405_v1 = vsel %vm1397_vm11, -1.0, %v3811_v10  ;;  %v1364_v3 = vsel %vm1356_vm13, 1.0, %v3811_v10 }
  0x74   : > { %v4238_v5 = vadd.f32 %v1404_v4, %v1364_v3 }
  0x75   : > { %735 = vmatmul.mubr.bf16.gmra.mxu0 %v4124_v6  ;;  %767 = vmatmul.mubr.bf16.gmra.mxu1 %v4127_v7 }
  0x76   : > { %3129 = vmatpush3.bf16.msra.mxu1 %v3621_v8  ;;  %935 = vmatprep.mubr.bf16.mxu1 %v3985_v12  ;;  %v3624_v8 = vld [vmem:[%s3962_s26 + $0x78] sm:$0xff]  }
  0x77   : > { %3130 = vmatprep.subr.bf16.mxu1 %v3622_v9  ;;  %1160 = vmatprep.mubr.bf16.mxu0 %v3985_v12  ;;  %v1408_v12 = vsel %vm1400_vm7, -1.0, %v3811_v10  ;;  %vm1357_vm7 = vmand %vm1245_vm4, %vm1349_vm5  ;;  %v3625_v9 = vld [vmem:[%s3962_s26 + $0x38] sm:$0xff]  }
  0x78   : > { %v4172_v32 = vadd.f32 %v1408_v12, %v1368_v25  ;;  %v1365_v63 = vsel %vm1357_vm7, 1.0, %v3811_v10  ;;  %v3626_v10 = vld [vmem:[%s3962_s26 + $0x70] sm:$0xff]   ;;  %3180 = vmatprep.subr.bf16.mxu0 %v3624_v8 }
  0x79   : > { %v4229_v2 = vadd.f32 %v1405_v1, %v1365_v63  ;;  %3181 = vmatpush3.bf16.msra.mxu0 %v3625_v9  ;;  %v3634_v25 = vld [vmem:[%s3962_s26 + $0x50] sm:$0xff]  }
  0x7a   : > { %3131 = vmatpush3.bf16.msra.mxu1 %v3623_v15  ;;  %3182 = vmatprep.subr.bf16.mxu0 %v3626_v10  ;;  %v3629_v15 = vld [vmem:[%s3962_s26 + $0x28] sm:$0xff]   ;;  %v3635_v12 = vld [vmem:[%s3962_s26 + $0x10] sm:$0xff]  }
  0x7b   : > { %3324 = vmatprep.subr.mxu1 %v4150_v16 }
  0x7d   : > { %936 = vmatmul.mubr.bf16.vlgmr.msra.gmra.mxu1 %v3999_v21  ;;  %3183 = vmatpush3.bf16.msra.mxu0 %v3627_v11 }
  0x7e   : > { %943 = vmatprep.mubr.bf16.mxu1 %v4009_v26  ;;  %3325 = vmatpush3.msra.mxu1 %v4150_v16 }
  0x7f   : > { %3326 = vmatprep.subr.mxu1 %v4162_v24  ;;  %3184 = vmatprep.subr.bf16.mxu0 %v3628_v14 }
  0x80   : > { %3327 = vmatpush3.msra.mxu1 %v4162_v24 }
  0x81   : > { %3328 = vmatprep.subr.mxu1 %v4167_v30  ;;  %3185 = vmatpush3.bf16.msra.mxu0 %v3629_v15  ;;  %v4302_v15 = vld [vmem:[%s5066_s6 + $0x50] sm:$0xff] }
  0x82   : > { %3329 = vmatpush3.msra.mxu1 %v4167_v30  ;;  %3186 = vmatprep.subr.bf16.mxu0 %v3630_v17 }
  0x83   : > { %3330 = vmatprep.subr.mxu1 %v4172_v32 }
  0x84   : > { %3331 = vmatpush3.msra.mxu1 %v4172_v32 }
  0x85   : > { %944 = vmatmul.mubr.bf16.gmra.mxu1 %v4026_v31  ;;  %3332 = vmatprep.subr.mxu1 %v4208_v49 }
  0x86   : > { %951 = vmatprep.mubr.bf16.mxu1 %v4040_v40  ;;  %3333 = vmatpush3.msra.mxu1 %v4208_v49 }
  0x87   : > { %3334 = vmatprep.subr.mxu1 %v4220_v62  ;;  %3187 = vmatpush3.bf16.msra.mxu0 %v3631_v18 }
  0x88   : > { %3335 = vmatpush3.msra.mxu1 %v4220_v62  ;;  %3188 = vmatprep.subr.bf16.mxu0 %v3632_v19 }
  0x89   : > { %3336 = vmatprep.subr.mxu1 %v4229_v2 }
  0x8a   : > { %3337 = vmatpush3.msra.mxu1 %v4229_v2 }
  0x8b   : > { %3338 = vmatprep.subr.mxu1 %v4238_v5  ;;  %3189 = vmatpush3.bf16.msra.mxu0 %v3633_v20 }
  0x8c   : > { %3339 = vmatpush3.msra.mxu1 %v4238_v5  ;;  %3190 = vmatprep.subr.bf16.mxu0 %v3634_v25 }
  0x8d   : > { %952 = vmatmul.mubr.bf16.gmra.mxu1 %v4069_v50  ;;  %3364 = vmatprep.subr.mxu1 %v4150_v16 }
  0x8e   : > { %959 = vmatprep.mubr.bf16.mxu1 %v4083_v57 }
  0x8f   : > { %3191 = vmatpush3.bf16.msra.mxu0 %v3635_v12  ;;  %v4323_v12 = vld [vmem:[%s5066_s6 + $0x58] sm:$0xff] }
  0x90   : > { %3192 = vmatprep.subr.bf16.mxu0 %v3636_v36 }
  0x93   : > { %3193 = vmatpush3.bf16.msra.mxu0 %v3637_v37 }
  0x94   : > { %3194 = vmatprep.subr.bf16.mxu0 %v3638_v38 }
  0x95   : > { %960 = vmatmul.mubr.bf16.gmra.mxu1 %v4124_v6 }
  0x96   : > { %967 = vmatprep.mubr.bf16.mxu1 %v3988_v13 }
  0x97   : > { %3195 = vmatpush3.bf16.msra.mxu0 %v3639_v42 }
  0x9a   : > { %1161 = vmatmul.mubr.bf16.vlgmr.msra.gmra.mxu0 %v3999_v21 }
  0x9b   : > { %1168 = vmatprep.mubr.bf16.mxu0 %v4009_v26 }
  0x9d   : > { %968 = vmatmul.mubr.bf16.gmra.mxu1 %v4004_v23 }
  0x9e   : > { %975 = vmatprep.mubr.bf16.mxu1 %v4012_v27 }
  0xa2   : > { %1169 = vmatmul.mubr.bf16.gmra.mxu0 %v4026_v31 }
  0xa3   : > { %1176 = vmatprep.mubr.bf16.mxu0 %v4040_v40 }
  0xa5   : > { %976 = vmatmul.mubr.bf16.gmra.mxu1 %v4030_v33 }
  0xa6   : > { %983 = vmatprep.mubr.bf16.mxu1 %v4043_v41 }
  0xaa   : > { %1177 = vmatmul.mubr.bf16.gmra.mxu0 %v4069_v50 }
  0xab   : > { %1184 = vmatprep.mubr.bf16.mxu0 %v4083_v57 }
  0xad   : > { %984 = vmatmul.mubr.bf16.gmra.mxu1 %v4072_v51 }
  0xae   : > { %991 = vmatprep.mubr.bf16.mxu1 %v4087_v58 }
  0xb2   : > { %1185 = vmatmul.mubr.bf16.gmra.mxu0 %v4124_v6 }
  0xb3   : > { %1192 = vmatprep.mubr.bf16.mxu0 %v3988_v13 }
  0xb5   : > { %992 = vmatmul.mubr.bf16.gmra.mxu1 %v4127_v7 }
  0xba   : > { %1193 = vmatmul.mubr.bf16.gmra.mxu0 %v4004_v23 }
  0xbb   : > { %1200 = vmatprep.mubr.bf16.mxu0 %v4012_v27 }
  0xc2   : > { %1201 = vmatmul.mubr.bf16.gmra.mxu0 %v4030_v33 }
  0xc3   : > { %1208 = vmatprep.mubr.bf16.mxu0 %v4043_v41 }
  0xca   : > { %1209 = vmatmul.mubr.bf16.gmra.mxu0 %v4072_v51 }
  0xcb   : > { %1216 = vmatprep.mubr.bf16.mxu0 %v4087_v58 }
  0xd2   : > { %1217 = vmatmul.mubr.bf16.gmra.mxu0 %v4127_v7 }
 0x11d   : > { %v3068_v44 = vpop.f32.mrf.mxu0  ;;  %v4262_v45 = vpop.f32.mrf.mxu1 }
 0x11f   : > { %v3069_v47 = vpop.f32.mrf.mxu0  ;;  %v4264_v48 = vpop.f32.mrf.mxu1 }
 0x120   : > { %v3070_v52 = vadd.f32 %v3069_v47, %v3068_v44 }
 0x121   : > { %v3071_v55 = vpop.f32.mrf.mxu0  ;;  %v4274_v56 = vpop.f32.mrf.mxu1 }
 0x122   : > { %v4278_v59 = vadd.f32 %v3070_v52, %v4272_v54 }
 0x123   : > { %v3072_v60 = vpop.f32.mrf.mxu0  ;;  %v4280_v61 = vpop.f32.mrf.mxu1 }
 0x124   : > { %v3073_v63 = vadd.f32 %v3072_v60, %v3071_v55  ;;  %3340 = vmatprep.mubr.msk.f32.mxu1 %vm1468_vm0, %v4278_v59  ;;  %v4345_v55 = vld [vmem:[%s5066_s6 + $0x60] sm:$0xff]  ;;  %v3097_v13 = vadd.f32 %v4280_v61, %v4274_v56 }
 0x125   : > { %v3074_v21 = vpop.f32.mrf.mxu0  ;;  %v3098_v0 = vpop.f32.mrf.mxu1  ;;  %v4413_v56 = vld [vmem:[%s5066_s6] sm:$0xff] }
 0x126   : > { %v4285_v1 = vadd.f32 %v3073_v63, %v4272_v54 }
 0x127   : > { %v3075_v3 = vpop.f32.mrf.mxu0  ;;  %v3099_v4 = vpop.f32.mrf.mxu1 }
 0x128   : > { %v3076_v8 = vadd.f32 %v3075_v3, %v3074_v21  ;;  %v3100_v9 = vadd.f32 %v3099_v4, %v3098_v0  ;;  %3341 = vmatmul.mubr.msk.f32.vlgmr.msra.gmra.mxu1 %vm1468_vm0, %v4285_v1  ;;  %v4356_v3 = vld [vmem:[%s5066_s6 + $0x68] sm:$0xff] }
 0x129   : > { %v3077_v26 = vpop.f32.mrf.mxu0  ;;  %v3101_v10 = vpop.f32.mrf.mxu1  ;;  %3365 = vmatpush3.msra.mxu1 %v4150_v16 }
 0x12a   : > { %v4293_v11 = vadd.f32 %v3076_v8, %v4272_v54  ;;  %v4296_v14 = vadd.f32 %v3100_v9, %v4272_v54  ;;  %3366 = vmatprep.subr.mxu1 %v4162_v24 }
 0x12b   : > { %v3078_v31 = vpop.f32.mrf.mxu0  ;;  %v3102_v17 = vpop.f32.mrf.mxu1  ;;  %3367 = vmatpush3.msra.mxu1 %v4162_v24 }
 0x12c   : > { %v3079_v16 = vadd.f32 %v3078_v31, %v3077_v26  ;;  %v3103_v18 = vadd.f32 %v3102_v17, %v3101_v10  ;;  %3343 = vmatprep.mubr.msk.f32.mxu1 %vm1468_vm0, %v4293_v11  ;;  %3368 = vmatprep.subr.mxu1 %v4167_v30  ;;  %v4311_v20 = vmul.f32 %v4302_v15, %v4296_v14 }
 0x12d   : > { %v3080_v40 = vpop.f32.mrf.mxu0  ;;  %v3104_v19 = vpop.f32.mrf.mxu1  ;;  %3369 = vmatpush3.msra.mxu1 %v4167_v30 }
 0x12e   : > { %v4314_v25 = vadd.f32 %v3079_v16, %v4272_v54  ;;  %v4317_v24 = vadd.f32 %v3103_v18, %v4272_v54  ;;  %3370 = vmatprep.subr.mxu1 %v4172_v32  ;;  %v4376_v16 = vld [vmem:[%s5066_s6 + $0x70] sm:$0xff] }
 0x12f   : > { %v3081_v36 = vpop.f32.mrf.mxu0  ;;  %v3105_v37 = vpop.f32.mrf.mxu1  ;;  %3371 = vmatpush3.msra.mxu1 %v4172_v32 }
 0x130   : > { %v3082_v30 = vadd.f32 %v3081_v36, %v3080_v40  ;;  %v3106_v38 = vadd.f32 %v3105_v37, %v3104_v19  ;;  %3344 = vmatmul.mubr.msk.f32.gmra.mxu1 %vm1468_vm0, %v4314_v25  ;;  %3372 = vmatprep.subr.mxu1 %v4208_v49  ;;  %v4333_v47 = vmul.f32 %v4323_v12, %v4317_v24 }
 0x131   : > { %v3083_v42 = vpop.f32.mrf.mxu0  ;;  %v3107_v44 = vpop.f32.mrf.mxu1  ;;  %3373 = vmatpush3.msra.mxu1 %v4208_v49  ;;  %v3094_v40 = vadd.f32 %v4264_v48, %v4262_v45 }
 0x132   : > { %v4336_v52 = vadd.f32 %v3082_v30, %v4272_v54  ;;  %v4339_v32 = vadd.f32 %v3106_v38, %v4272_v54  ;;  %3374 = vmatprep.subr.mxu1 %v4220_v62 }
 0x133   : > { %v3084_v50 = vpop.f32.mrf.mxu0  ;;  %v3108_v49 = vpop.f32.mrf.mxu1  ;;  %3375 = vmatpush3.msra.mxu1 %v4220_v62 }
 0x134   : > { %v3085_v60 = vadd.f32 %v3084_v50, %v3083_v42  ;;  %v3109_v63 = vadd.f32 %v3108_v49, %v3107_v44  ;;  %3346 = vmatprep.mubr.msk.f32.mxu1 %vm1468_vm0, %v4336_v52  ;;  %3376 = vmatprep.subr.mxu1 %v4229_v2  ;;  %v4360_v57 = vmul.f32 %v4345_v55, %v4339_v32  ;;  %v4394_v42 = vld [vmem:[%s5066_s6 + $0x78] sm:$0xff] }
 0x135   : > { %v3086_v21 = vpop.f32.mrf.mxu0  ;;  %v3110_v0 = vpop.f32.mrf.mxu1  ;;  %3377 = vmatpush3.msra.mxu1 %v4229_v2  ;;  %v4403_v44 = vadd.f32 %v3094_v40, %v4272_v54 }
 0x136   : > { %v4363_v62 = vadd.f32 %v3085_v60, %v4272_v54  ;;  %v764_v4 = vadd.f32 %v3109_v63, %v4272_v54  ;;  %3378 = vmatprep.subr.mxu1 %v4238_v5  ;;  %v4419_v63 = vadd.f32 %v3097_v13, %v4272_v54 }
 0x137   : > { %v3087_v8 = vpop.f32.mrf.mxu0  ;;  %v3111_v9 = vpop.f32.mrf.mxu1  ;;  %3379 = vmatpush3.msra.mxu1 %v4238_v5 }
 0x138   : > { %v3088_v2 = vadd.f32 %v3087_v8, %v3086_v21  ;;  %v3112_v26 = vadd.f32 %v3111_v9, %v3110_v0  ;;  %3347 = vmatmul.mubr.msk.f32.gmra.mxu1 %vm1468_vm0, %v4363_v62  ;;  %v4371_v10 = vmul.f32 %v4356_v3, %v764_v4  ;;  %v4430_v9 = vld [vmem:[%s5066_s6 + $0x8] sm:$0xff] }
 0x139   : > { %v3089_v31 = vpop.f32.mrf.mxu0  ;;  %v3113_v17 = vpop.f32.mrf.mxu1 }
 0x13a   : > { %v4380_v18 = vadd.f32 %v3088_v2, %v4272_v54  ;;  %v769_v5 = vadd.f32 %v3112_v26, %v4272_v54 }
 0x13b   : > { %v3090_v19 = vpop.f32.mrf.mxu0  ;;  %v3114_v36 = vpop.f32.mrf.mxu1 }
 0x13c   : > { %v3091_v37 = vadd.f32 %v3090_v19, %v3089_v31  ;;  %v3115_v30 = vadd.f32 %v3114_v36, %v3113_v17  ;;  %3349 = vmatprep.mubr.msk.f32.mxu1 %vm1468_vm0, %v4380_v18  ;;  %v4389_v38 = vmul.f32 %v4376_v16, %v769_v5 }
 0x13d   : > { %v3132_v6 = vpop.f32.mrf.mxu1 }
 0x13e   : > { %v4399_v45 = vadd.f32 %v3091_v37, %v4272_v54  ;;  %v772_v48 = vadd.f32 %v3115_v30, %v4272_v54 }
 0x13f   : > { %v3133_v50 = vpop.f32.mrf.mxu1 }
 0x140   : > { %v3134_v49 = vadd.f32 %v3133_v50, %v3132_v6  ;;  %3350 = vmatmul.mubr.msk.f32.gmra.mxu1 %vm1468_vm0, %v4399_v45  ;;  %v4408_v60 = vmul.f32 %v4394_v42, %v772_v48 }
 0x141   : > { %v3135_v61 = vpop.f32.mrf.mxu1  ;;  %3352 = vmatprep.mubr.msk.f32.mxu1 %vm1468_vm0, %v4403_v44 }
 0x142   : > { %v4422_v21 = vmul.f32 %v3134_v49, %v4413_v56 }
 0x143   : > { %v3136_v0 = vpop.f32.mrf.mxu1 }
 0x144   : > { %v3137_v8 = vadd.f32 %v3136_v0, %v3135_v61  ;;  %3353 = vmatmul.mubr.msk.f32.gmra.mxu1 %vm1468_vm0, %v4419_v63 }
 0x145   : > { %v3138_v2 = vpop.f32.mrf.mxu1  ;;  %3355 = vmatprep.mubr.msk.f32.mxu1 %vm1468_vm0, %v4296_v14 }
 0x146   : > { %v4435_v23 = vmul.f32 %v3137_v8, %v4430_v9 }
 0x147   : > { %v3139_v54 = vpop.f32.mrf.mxu1 }
 0x148   : > { %3356 = vmatmul.mubr.msk.f32.gmra.mxu1 %vm1468_vm0, %v4317_v24  ;;  %v4449_v24 = vadd.f32 %v3139_v54, %v3138_v2 }
 0x149   : > { %v3141_v27 = vpop.f32.mrf.mxu1  ;;  %3358 = vmatprep.mubr.msk.f32.mxu1 %vm1468_vm0, %v4339_v32 }
 0x14b   : > { %v3142_v26 = vpop.f32.mrf.mxu1 }
 0x14c   : > { %3359 = vmatmul.mubr.msk.f32.gmra.mxu1 %vm1468_vm0, %v764_v4  ;;  %v4454_v32 = vadd.f32 %v3142_v26, %v3141_v27 }
 0x14d   : > { %v3144_v31 = vpop.f32.mrf.mxu1  ;;  %3361 = vmatprep.mubr.msk.f32.mxu1 %vm1468_vm0, %v769_v5 }
 0x14f   : > { %v3145_v14 = vpop.f32.mrf.mxu1 }
 0x150   : > { %3362 = vmatmul.mubr.msk.f32.gmra.mxu1 %vm1468_vm0, %v772_v48  ;;  %v4456_v4 = vadd.f32 %v3145_v14, %v3144_v31 }
 0x151   : > { %v3147_v17 = vpop.f32.mrf.mxu1  ;;  %3380 = vmatprep.mubr.msk.f32.mxu1 %vm1468_vm0, %v3134_v49 }
 0x153   : > { %v3148_v33 = vpop.f32.mrf.mxu1 }
 0x154   : > { %3381 = vmatmul.mubr.msk.f32.vlgmr.msra.gmra.mxu1 %vm1468_vm0, %v3137_v8  ;;  %v4463_v58 = vadd.f32 %v3148_v33, %v3147_v17 }
 0x155   : > { %v3150_v41 = vpop.f32.mrf.mxu1  ;;  %3383 = vmatprep.mubr.msk.f32.mxu1 %vm1468_vm0, %v4449_v24 }
 0x157   : > { %v3151_v5 = vpop.f32.mrf.mxu1 }
 0x158   : > { %3384 = vmatmul.mubr.msk.f32.gmra.mxu1 %vm1468_vm0, %v4454_v32  ;;  %v4465_v40 = vadd.f32 %v3151_v5, %v3150_v41 }
 0x159   : > { %v3153_v51 = vpop.f32.mrf.mxu1  ;;  %3386 = vmatprep.mubr.msk.f32.mxu1 %vm1468_vm0, %v4456_v4 }
 0x15b   : > { %v3154_v19 = vpop.f32.mrf.mxu1 }
 0x15c   : > { %3387 = vmatmul.mubr.msk.f32.gmra.mxu1 %vm1468_vm0, %v4463_v58  ;;  %v4471_v37 = vadd.f32 %v3154_v19, %v3153_v51 }
 0x15d   : > { %v3156_v36 = vpop.f32.mrf.mxu1  ;;  %3389 = vmatprep.mubr.msk.f32.mxu1 %vm1468_vm0, %v4465_v40 }
 0x15f   : > { %v3157_v30 = vpop.f32.mrf.mxu1 }
 0x160   : > { %v4473_v6 = vadd.f32 %v3157_v30, %v3156_v36  ;;  %3390 = vmatmul.mubr.msk.f32.gmra.mxu1 %vm1468_vm0, %v4471_v37  ;;  %v4510_v30 = vld [vmem:[%s5067_s7 + $0x8] sm:$0xff] }
 0x161   : > { %v3159_v7 = vpop.f32.mrf.mxu1 }
 0x162   : > { %3392 = vmatprep.mubr.msk.f32.mxu1 %vm1468_vm0, %v4473_v6 }
 0x163   : > { %v3160_v13 = vpop.f32.mrf.mxu1 }
 0x164   : > { %v4479_v48 = vadd.f32 %v3160_v13, %v3159_v7  ;;  %v4515_v13 = vld [vmem:[%s5067_s7] sm:$0xff] }
 0x165   : > { %v3162_v50 = vpop.f32.mrf.mxu1 }
 0x166   : > { %3393 = vmatmul.mubr.msk.f32.gmra.mxu1 %vm1468_vm0, %v4479_v48 }
 0x167   : > { %v3163_v49 = vpop.f32.mrf.mxu1 }
 0x168   : > { %v4483_v61 = vadd.f32 %v3163_v49, %v3162_v50 }
 0x169   : > { %v3165_v0 = vpop.f32.mrf.mxu1 }
 0x16a   : > { %3395 = vmatprep.mubr.msk.f32.mxu1 %vm1468_vm0, %v4483_v61 }
 0x16b   : > { %v3166_v8 = vpop.f32.mrf.mxu1 }
 0x16c   : > { %v4487_v2 = vadd.f32 %v3166_v8, %v3165_v0  ;;  %v1453_v0 = vmul.f32 %v4430_v9, %v4285_v1  ;;  %v1452_v8 = vmul.f32 %v4413_v56, %v4278_v59  ;;  %v4536_v1 = vld [vmem:[%s5066_s6 + $0x10] sm:$0xff] }
 0x16d   : > { %v3168_v54 = vpop.f32.mrf.mxu1  ;;  %v4541_v56 = vld [vmem:[%s5067_s7 + $0x10] sm:$0xff] }
 0x16e   : > { %3396 = vmatmul.mubr.msk.f32.gmra.mxu1 %vm1468_vm0, %v4487_v2 }
 0x16f   : > { %v3169_v27 = vpop.f32.mrf.mxu1 }
 0x170   : > { %v4491_v26 = vadd.f32 %v3169_v27, %v3168_v54 }
 0x171   : > { %v3171_v31 = vpop.f32.mrf.mxu1 }
 0x172   : > { %3398 = vmatprep.mubr.msk.f32.mxu1 %vm1468_vm0, %v4491_v26 }
 0x173   : > { %v3172_v14 = vpop.f32.mrf.mxu1 }
 0x174   : > { %v4495_v17 = vadd.f32 %v3172_v14, %v3171_v31  ;;  %v4526_v14 = vld [vmem:[%s5066_s6 + $0x18] sm:$0xff] }
 0x175   : > { %v3174_v33 = vpop.f32.mrf.mxu1  ;;  %v1455_v9 = vmul.f32 %v4526_v14, %v4314_v25  ;;  %v4562_v25 = vld [vmem:[%s5067_s7 + $0x28] sm:$0xff] }
 0x176   : > { %3399 = vmatmul.mubr.msk.f32.gmra.mxu1 %vm1468_vm0, %v4495_v17 }
 0x177   : > { %v3175_v41 = vpop.f32.mrf.mxu1 }
 0x178   : > { %v4499_v5 = vadd.f32 %v3175_v41, %v3174_v33  ;;  %v4531_v33 = vld [vmem:[%s5067_s7 + $0x18] sm:$0xff] }
 0x179   : > { %v3177_v51 = vpop.f32.mrf.mxu1 }
 0x17a   : > { %3401 = vmatprep.mubr.msk.f32.mxu1 %vm1468_vm0, %v4499_v5 }
 0x17b   : > { %v3178_v19 = vpop.f32.mrf.mxu1 }
 0x17c   : > { %v4503_v36 = vadd.f32 %v3178_v19, %v3177_v51 }
 0x17e   : > { %3402 = vmatmul.mubr.msk.f32.gmra.mxu1 %vm1468_vm0, %v4503_v36 }
 0x1e8   : > { %v3342_v7 = vpop.f32.mrf.mxu1 }
 0x1e9   : > { %v1663_v50 = vmul.f32 %v3342_v7, %v4510_v30 }
 0x1ea   : > { %v1583_v49 = vpop.f32.mrf.mxu1 }
 0x1eb   : > { %v1662_v54 = vmul.f32 %v1583_v49, %v4515_v13  ;;  %v1679_v27 = vadd.f32 %v1663_v50, %v1453_v0  ;;  %v1454_v50 = vmul.f32 %v4536_v1, %v4293_v11  ;;  %v4569_v11 = vld [vmem:[%s5066_s6 + $0x20] sm:$0xff] }
 0x1ed   : > { %v1678_v31 = vadd.f32 %v1662_v54, %v1452_v8  ;;  %v4557_v8 = vld [vmem:[%s5066_s6 + $0x28] sm:$0xff]  ;;  %v4589_v54 = vld [vmem:[%s5066_s6 + $0x38] sm:$0xff] }
 0x1ef   : > { %v1935_v41 = vpack.c.bf16 %v1679_v27, %v1678_v31  ;;  %v4574_v31 = vld [vmem:[%s5067_s7 + $0x20] sm:$0xff] }
 0x1f0   : > { %v3345_v59 = vpop.f32.mrf.mxu1 }
 0x1f1   : > { %v1665_v51 = vmul.f32 %v3345_v59, %v4531_v33  ;;  %3420 = vmatprep.mubr.msk.bf16.mxu0 %vm1468_vm0, %v1935_v41  ;;  %v1457_v41 = vmul.f32 %v4557_v8, %v4363_v62  ;;  %v4594_v62 = vld [vmem:[%s5067_s7 + $0x38] sm:$0xff] }
 0x1f2   : > { %v1593_v19 = vpop.f32.mrf.mxu1 }
 0x1f3   : > { %v4547_v7 = vadd.f32 %v1665_v51, %v1455_v9  ;;  %v1664_v49 = vmul.f32 %v1593_v19, %v4541_v56  ;;  %v1456_v19 = vmul.f32 %v4569_v11, %v4336_v52  ;;  %v4601_v52 = vld [vmem:[%s5066_s6 + $0x30] sm:$0xff] }
 0x1f4   : > { %v1458_v29 = vmul.f32 %v4601_v52, %v4380_v18 }
 0x1f5   : > { %v4552_v0 = vadd.f32 %v1664_v49, %v1454_v50 }
 0x1f8   : > { %v3348_v27 = vpop.f32.mrf.mxu1 }
 0x1f9   : > { %v1667_v59 = vmul.f32 %v3348_v27, %v4562_v25 }
 0x1fa   : > { %v1603_v9 = vpop.f32.mrf.mxu1 }
 0x1fb   : > { %v4579_v51 = vadd.f32 %v1667_v59, %v1457_v41  ;;  %v1666_v50 = vmul.f32 %v1603_v9, %v4574_v31  ;;  %v4606_v59 = vld [vmem:[%s5067_s7 + $0x30] sm:$0xff]  ;;  %v1459_v9 = vmul.f32 %v4589_v54, %v4399_v45 }
 0x1fd   : > { %5133 = vst [vmem:[#allocation24_spill] sm:$0xff] %v4579_v51  ;;  %v4584_v49 = vadd.f32 %v1666_v50, %v1456_v19  ;;  %v4614_v50 = vld [vmem:[%s5066_s6 + $0x48] sm:$0xff] }
 0x1ff   : > { %5134 = vst [vmem:[#allocation25_spill] sm:$0xff] %v4584_v49 }
 0x200   : > { %v3351_v41 = vpop.f32.mrf.mxu1 }
 0x201   : > { %v1669_v19 = vmul.f32 %v3351_v41, %v4594_v62  ;;  %v4629_v41 = vld [vmem:[%s5066_s6 + $0x40] sm:$0xff] }
 0x202   : > { %v1613_v27 = vpop.f32.mrf.mxu1 }
 0x203   : > { %v4621_v43 = vadd.f32 %v1669_v19, %v1459_v9  ;;  %v1668_v45 = vmul.f32 %v1613_v27, %v4606_v59  ;;  %v1461_v9 = vmul.f32 %v4614_v50, %v4419_v63  ;;  %v4644_v27 = vld [vmem:[%s5067_s7 + $0x58] sm:$0xff] }
 0x204   : > { %v3354_v53 = vpop.f32.mrf.mxu1 }
 0x205   : > { %5135 = vst [vmem:[#allocation26_spill] sm:$0xff] %v4621_v43  ;;  %v4636_v35 = vadd.f32 %v1668_v45, %v1458_v29  ;;  %v1671_v18 = vmul.f32 %v3354_v53, %v4619_v28  ;;  %v1460_v29 = vmul.f32 %v4629_v41, %v4403_v44  ;;  %v4656_v53 = vld [vmem:[%s5067_s7 + $0x50] sm:$0xff]  ;;  %v4684_v44 = vld [vmem:[%s5067_s7 + $0x78] sm:$0xff] }
 0x206   : > { %v1623_v19 = vpop.f32.mrf.mxu1 }
 0x207   : > { %5136 = vst [vmem:[#allocation27_spill] sm:$0xff] %v4636_v35  ;;  %v4648_v34 = vadd.f32 %v1671_v18, %v1461_v9  ;;  %v1670_v45 = vmul.f32 %v1623_v19, %v4634_v46  ;;  %v4664_v9 = vld [vmem:[%s5067_s7 + $0x68] sm:$0xff] }
 0x208   : > { %v3357_v39 = vpop.f32.mrf.mxu1 }
 0x209   : > { %5137 = vst [vmem:[#allocation28_spill] sm:$0xff] %v4648_v34  ;;  %v4658_v63 = vadd.f32 %v1670_v45, %v1460_v29  ;;  %v1673_v49 = vmul.f32 %v3357_v39, %v4644_v27  ;;  %v4675_v29 = vld [vmem:[%s5067_s7 + $0x60] sm:$0xff] }
 0x20a   : > { %v1633_v51 = vpop.f32.mrf.mxu1 }
 0x20b   : > { %5138 = vst [vmem:[#allocation29_spill] sm:$0xff] %v4658_v63  ;;  %v4669_v18 = vadd.f32 %v1673_v49, %v4333_v47  ;;  %v1672_v19 = vmul.f32 %v1633_v51, %v4656_v53 }
 0x20c   : > { %v3360_v22 = vpop.f32.mrf.mxu1 }
 0x20d   : > { %5139 = vst [vmem:[#allocation30_spill] sm:$0xff] %v4669_v18  ;;  %v4678_v39 = vadd.f32 %v1672_v19, %v4311_v20  ;;  %v1675_v45 = vmul.f32 %v3360_v22, %v4664_v9  ;;  %v4695_v20 = vld [vmem:[%s5067_s7 + $0x70] sm:$0xff] }
 0x20e   : > { %v1643_v35 = vpop.f32.mrf.mxu1 }
 0x20f   : > { %5140 = vst [vmem:[#allocation31_spill] sm:$0xff] %v4678_v39  ;;  %v4689_v51 = vadd.f32 %v1675_v45, %v4371_v10  ;;  %v1674_v49 = vmul.f32 %v1643_v35, %v4675_v29 }
 0x210   : > { %v3363_v63 = vpop.f32.mrf.mxu1 }
 0x211   : > { %v4698_v22 = vadd.f32 %v1674_v49, %v4360_v57  ;;  %v1677_v19 = vmul.f32 %v3363_v63, %v4684_v44 }
 0x212   : > { %v1653_v34 = vpop.f32.mrf.mxu1 }
 0x213   : > { %v4704_v10 = vadd.f32 %v1677_v19, %v4408_v60  ;;  %v1676_v35 = vmul.f32 %v1653_v34, %v4695_v20  ;;  %v1697_v60 = vmul.f32 %v4454_v32, %v4526_v14  ;;  %v1698_v32 = vmul.f32 %v4456_v4, %v4569_v11 }
 0x214   : > { %v3382_v45 = vpop.f32.mrf.mxu1  ;;  %v1701_v4 = vmul.f32 %v4471_v37, %v4589_v54  ;;  %v1702_v37 = vmul.f32 %v4473_v6, %v4629_v41  ;;  %v1703_v54 = vmul.f32 %v4479_v48, %v4614_v50  ;;  %v1705_v48 = vmul.f32 %v4487_v2, %v4323_v12 }
 0x215   : > { %v4708_v39 = vadd.f32 %v1676_v35, %v4389_v38  ;;  %v1904_v18 = vmul.f32 %v3382_v45, %v4510_v30  ;;  %v1696_v30 = vmul.f32 %v4449_v24, %v4536_v1  ;;  %v1706_v12 = vmul.f32 %v4491_v26, %v4345_v55 }
 0x216   : > { %v1824_v43 = vpop.f32.mrf.mxu1  ;;  %v1709_v55 = vmul.f32 %v4503_v36, %v4394_v42 }
 0x217   : > { %v1920_v63 = vadd.f32 %v1904_v18, %v4435_v23  ;;  %v1903_v49 = vmul.f32 %v1824_v43, %v4515_v13 }
 0x218   : > { %v3385_v47 = vpop.f32.mrf.mxu1 }
 0x219   : > { %v1919_v34 = vadd.f32 %v1903_v49, %v4422_v21  ;;  %v1906_v19 = vmul.f32 %v3385_v47, %v4531_v33  ;;  %v1699_v21 = vmul.f32 %v4463_v58, %v4557_v8  ;;  %v3196_v33 = vpop.f32.mrf.mxu0 }
 0x21a   : > { %v1834_v38 = vpop.f32.mrf.mxu1 }
 0x21b   : > { %v4721_v35 = vpack.c.bf16 %v1920_v63, %v1919_v34  ;;  %v1922_v45 = vadd.f32 %v1906_v19, %v1697_v60  ;;  %v1905_v57 = vmul.f32 %v1834_v38, %v4541_v56  ;;  %v1700_v60 = vmul.f32 %v4465_v40, %v4601_v52 }
 0x21c   : > { %v3388_v23 = vpop.f32.mrf.mxu1 }
 0x21d   : > { %v1921_v18 = vadd.f32 %v1905_v57, %v1696_v30  ;;  %v1908_v43 = vmul.f32 %v3388_v23, %v4562_v25  ;;  %v3197_v57 = vpop.f32.mrf.mxu0 }
 0x21e   : > { %v1844_v13 = vpop.f32.mrf.mxu1  ;;  %v3198_v25 = vadd.f32 %v3197_v57, %v3196_v33 }
 0x21f   : > { %v4729_v14 = vpack.c.bf16 %v1922_v45, %v1921_v18  ;;  %v1907_v24 = vmul.f32 %v1844_v13, %v4574_v31  ;;  %v1924_v47 = vadd.f32 %v1908_v43, %v1699_v21  ;;  %v3199_v11 = vpop.f32.mrf.mxu0 }
 0x220   : > { %v3391_v1 = vpop.f32.mrf.mxu1 }
 0x221   : > { %v1923_v63 = vadd.f32 %v1907_v24, %v1698_v32  ;;  %v1910_v56 = vmul.f32 %v3391_v1, %v4594_v62  ;;  %v3200_v19 = vpop.f32.mrf.mxu0 }
 0x222   : > { %v1854_v49 = vpop.f32.mrf.mxu1  ;;  %v3201_v30 = vadd.f32 %v3200_v19, %v3199_v11 }
 0x223   : > { %v4737_v58 = vpack.c.bf16 %v1924_v47, %v1923_v63  ;;  %v1909_v8 = vmul.f32 %v1854_v49, %v4606_v59  ;;  %v1926_v31 = vadd.f32 %v1910_v56, %v1701_v4  ;;  %v3202_v23 = vpop.f32.mrf.mxu0 }
 0x224   : > { %v4743_v40 = vpack.c.bf16 %v3201_v30, %v3198_v25 }
 0x225   : > { %v1925_v34 = vadd.f32 %v1909_v8, %v1700_v60  ;;  %v3203_v59 = vpop.f32.mrf.mxu0 }
 0x226   : > { %v3394_v38 = vpop.f32.mrf.mxu1  ;;  %v3204_v43 = vadd.f32 %v3203_v59, %v3202_v23 }
 0x227   : > { %v4740_v62 = vpack.c.bf16 %v1926_v31, %v1925_v34  ;;  %v1912_v45 = vmul.f32 %v3394_v38, %v4619_v28  ;;  %v3205_v21 = vpop.f32.mrf.mxu0 }
 0x228   : > { %v1864_v18 = vpop.f32.mrf.mxu1 }
 0x229   : > { %v1911_v52 = vmul.f32 %v1864_v18, %v4634_v46  ;;  %v1928_v13 = vadd.f32 %v1912_v45, %v1703_v54  ;;  %v3206_v28 = vpop.f32.mrf.mxu0  ;;  %v1704_v46 = vmul.f32 %v4483_v61, %v4302_v15  ;;  %v1707_v61 = vmul.f32 %v4495_v17, %v4356_v3 }
 0x22a   : > { %v3207_v1 = vadd.f32 %v3206_v28, %v3205_v21 }
 0x22b   : > { %v1927_v32 = vadd.f32 %v1911_v52, %v1702_v37  ;;  %v4753_v63 = vpop.f32.mrf.mxu0  ;;  %v1708_v37 = vmul.f32 %v4499_v5, %v4376_v16 }
 0x22c   : > { %v4755_v41 = vpack.c.bf16 %v3207_v1, %v3204_v43 }
 0x22d   : > { %v4750_v24 = vpack.c.bf16 %v1928_v13, %v1927_v32  ;;  %v4762_v56 = vpop.f32.mrf.mxu0 }
 0x22e   : > { %v3397_v33 = vpop.f32.mrf.mxu1 }
 0x22f   : > { %v1914_v47 = vmul.f32 %v3397_v33, %v4644_v27  ;;  %v4764_v25 = vpop.f32.mrf.mxu0 }
 0x230   : > { %v1874_v6 = vpop.f32.mrf.mxu1 }
 0x231   : > { %v1913_v50 = vmul.f32 %v1874_v6, %v4656_v53  ;;  %v1930_v57 = vadd.f32 %v1914_v47, %v1705_v48  ;;  %v4766_v60 = vpop.f32.mrf.mxu0 }
 0x233   : > { %v1929_v49 = vadd.f32 %v1913_v50, %v1704_v46  ;;  %v4769_v11 = vpop.f32.mrf.mxu0 }
 0x235   : > { %v1948_v27 = vpack.c.bf16 %v1930_v57, %v1929_v49  ;;  %v3215_v53 = vpop.f32.mrf.mxu0  ;;  %v1988_v49 = vsel %vm1468_vm0, %v4750_v24, 0 }
 0x236   : > { %v3400_v4 = vpop.f32.mrf.mxu1 }
 0x237   : > { %v1916_v8 = vmul.f32 %v3400_v4, %v4664_v9  ;;  %v3217_v19 = vpop.f32.mrf.mxu0  ;;  %v1991_v28 = vsel %vm1468_vm0, %v1948_v27, 0 }
 0x238   : > { %v1884_v15 = vpop.f32.mrf.mxu1 }
 0x239   : > { %v1915_v2 = vmul.f32 %v1884_v15, %v4675_v29  ;;  %v1932_v31 = vadd.f32 %v1916_v8, %v1707_v61  ;;  %v3218_v30 = vpop.f32.mrf.mxu0 }
 0x23b   : > { %v1931_v34 = vadd.f32 %v1915_v2, %v1706_v12  ;;  %v3220_v23 = vpop.f32.mrf.mxu0 }
 0x23d   : > { %v1949_v38 = vpack.c.bf16 %v1932_v31, %v1931_v34  ;;  %v3221_v26 = vpop.f32.mrf.mxu0  ;;  %v1985_v31 = vsel %vm1468_vm0, %v4740_v62, 0  ;;  %v3219_v34 = vadd.f32 %v3218_v30, %v3217_v19  ;;  %v5148_v30 = vld [vmem:[#allocation28_spill] sm:$0xff] }
 0x23e   : > { %v3403_v45 = vpop.f32.mrf.mxu1  ;;  %v3222_v12 = vadd.f32 %v3221_v26, %v3220_v23  ;;  %v5157_v26 = vld [vmem:[#allocation18_spill] sm:$0xff] }
 0x23f   : > { %v1918_v9 = vmul.f32 %v3403_v45, %v4684_v44  ;;  %v3223_v54 = vpop.f32.mrf.mxu0  ;;  %v1994_v42 = vsel %vm1468_vm0, %v1949_v38, 0  ;;  %v3210_v45 = vadd.f32 %v4762_v56, %v4753_v63  ;;  %v1979_v63 = vsel %vm1468_vm0, %v4729_v14, 0  ;;  %v5142_v56 = vld [vmem:[#allocation24_spill] sm:$0xff] }
 0x240   : > { %v1894_v18 = vpop.f32.mrf.mxu1 }
 0x241   : > { %v1917_v3 = vmul.f32 %v1894_v18, %v4695_v20  ;;  %v1934_v17 = vadd.f32 %v1918_v9, %v1709_v55  ;;  %v3224_v59 = vpop.f32.mrf.mxu0  ;;  %v3213_v9 = vadd.f32 %v4766_v60, %v4764_v25  ;;  %v5143_v25 = vld [vmem:[#allocation25_spill] sm:$0xff]  ;;  %v5155_v55 = vpack.c.bf16 %v4704_v10, %v4708_v39  ;;  %v5160_v10 = vld [vmem:[#allocation23_spill] sm:$0xff] }
 0x242   : > { %v3225_v61 = vadd.f32 %v3224_v59, %v3223_v54  ;;  %v5144_v60 = vpack.c.bf16 %v5142_v56, %v5143_v25  ;;  %vm2105_vm4 = vcmp.le.s32.totalorder %v5157_v26, %v5160_v10 }
 0x243   : > { %v1933_v29 = vadd.f32 %v1917_v3, %v1708_v37  ;;  %v3226_v43 = vpop.f32.mrf.mxu0  ;;  %v5152_v37 = vld [vmem:[#allocation31_spill] sm:$0xff]  ;;  %v5156_v3 = vld [vmem:[#allocation22_spill] sm:$0xff] }
 0x244   : > { %vm2106_vm1 = vcmp.le.s32.totalorder %v5157_v26, %v5156_v3 }
 0x245   : > { %v1950_v52 = vpack.c.bf16 %v1934_v17, %v1933_v29  ;;  %v3227_v16 = vpop.f32.mrf.mxu0  ;;  %v5158_v29 = vld [vmem:[#allocation15_spill] sm:$0xff] }
 0x246   : > { %v3228_v4 = vadd.f32 %v3227_v16, %v3226_v43  ;;  %vm2104_vm2 = vcmp.le.s32.totalorder %v5157_v26, %v5158_v29 }
 0x247   : > { %3484 = vmatprep.subr.msk.bf16.mxu0 %vm1468_vm0, %v1950_v52  ;;  %v1997_v44 = vsel %vm1468_vm0, %v1950_v52, 0  ;;  %v3229_v5 = vpop.f32.mrf.mxu0 }
 0x248   : > { %3405 = vmatpush3.bf16.xpose.msra.mxu0 %v1997_v44 }
 0x249   : > { %3485 = vmatprep.subr.msk.bf16.mxu0 %vm1468_vm0, %v1949_v38  ;;  %v3230_v13 = vpop.f32.mrf.mxu0  ;;  %v2260_v38 = vpack.c.bf16 %v3225_v61, %v3222_v12 }
 0x24a   : > { %v3231_v8 = vadd.f32 %v3230_v13, %v3229_v5  ;;  %v5161_v5 = vld [vmem:[#allocation20_spill] sm:$0xff] }
 0x24b   : > { %v3232_v36 = vpop.f32.mrf.mxu0  ;;  %vm2108_vm5 = vcmp.le.s32.totalorder %v5157_v26, %v5161_v5 }
 0x24c   : > { %v2261_v2 = vpack.c.bf16 %v3231_v8, %v3228_v4  ;;  %v2099_v8 = vadd.s32 88, %v5158_v29 }
 0x24d   : > { %v3233_v20 = vpop.f32.mrf.mxu0 }
 0x24e   : > { %v3234_v6 = vadd.f32 %v3233_v20, %v3232_v36  ;;  %v5162_v20 = vld [vmem:[#allocation17_spill] sm:$0xff]  ;;  %vm2115_vm12 = vcmp.le.s32.totalorder %v5157_v26, %v2099_v8 }
 0x24f   : > { %v3235_v32 = vpop.f32.mrf.mxu0  ;;  %vm2110_vm6 = vcmp.le.s32.totalorder %v5157_v26, %v5162_v20 }
 0x250   : > { %3407 = vmatpush3.bf16.xpose.msra.mxu0 %v1994_v42 }
 0x251   : > { %3486 = vmatprep.subr.msk.bf16.mxu0 %vm1468_vm0, %v1948_v27  ;;  %v3236_v21 = vpop.f32.mrf.mxu0 }
 0x252   : > { %v3237_v46 = vadd.f32 %v3236_v21, %v3235_v32  ;;  %v5163_v32 = vld [vmem:[#allocation19_spill] sm:$0xff]  ;;  %v2096_v21 = vadd.s32 64, %v5158_v29 }
 0x253   : > { %v3238_v33 = vpop.f32.mrf.mxu0  ;;  %vm2109_vm7 = vcmp.le.s32.totalorder %v5157_v26, %v5163_v32 }
 0x254   : > { %v2262_v15 = vpack.c.bf16 %v3237_v46, %v3234_v6  ;;  %v5164_v6 = vld [vmem:[#allocation16_spill] sm:$0xff]  ;;  %vm2112_vm9 = vcmp.le.s32.totalorder %v5157_v26, %v2096_v21  ;;  %v2098_v46 = vadd.s32 80, %v5158_v29 }
 0x255   : > { %v3239_v1 = vpop.f32.mrf.mxu0  ;;  %vm2111_vm8 = vcmp.le.s32.totalorder %v5157_v26, %v5164_v6 }
 0x256   : > { %v3240_v48 = vadd.f32 %v3239_v1, %v3238_v33  ;;  %vm2114_vm10 = vcmp.le.s32.totalorder %v5157_v26, %v2098_v46 }
 0x257   : > { %v3241_v47 = vpop.f32.mrf.mxu0 }
 0x258   : > { %3409 = vmatpush3.bf16.xpose.msra.mxu0 %v1991_v28 }
 0x259   : > { %3487 = vmatprep.subr.msk.bf16.mxu0 %vm1468_vm0, %v4750_v24  ;;  %v3242_v50 = vpop.f32.mrf.mxu0  ;;  %v3216_v24 = vadd.f32 %v3215_v53, %v4769_v11  ;;  %v2258_v11 = vpack.c.bf16 %v3213_v9, %v3210_v45  ;;  %v5145_v53 = vld [vmem:[#allocation26_spill] sm:$0xff] }
 0x25a   : > { %v3243_v57 = vadd.f32 %v3242_v50, %v3241_v47 }
 0x25b   : > { %v2259_v23 = vpack.c.bf16 %v3219_v34, %v3216_v24  ;;  %v2101_v24 = vadd.s32 104, %v5158_v29 }
 0x25c   : > { %v2263_v27 = vpack.c.bf16 %v3243_v57, %v3240_v48  ;;  %v2097_v48 = vadd.s32 72, %v5158_v29 }
 0x25d   : > { %vm2117_vm15 = vcmp.le.s32.totalorder %v5157_v26, %v2101_v24 }
 0x25e   : > { %3436 = vmatprep.subr.bf16.mxu1 %v2263_v27  ;;  %vm2113_vm11 = vcmp.le.s32.totalorder %v5157_v26, %v2097_v48 }
 0x25f   : > { %3437 = vmatpush3.bf16.msra.mxu1 %v2263_v27 }
 0x260   : > { %3411 = vmatpush3.bf16.xpose.msra.mxu0 %v1988_v49  ;;  %3438 = vmatprep.subr.bf16.mxu1 %v2262_v15 }
 0x261   : > { %3488 = vmatprep.subr.msk.bf16.mxu0 %vm1468_vm0, %v4740_v62  ;;  %v1982_v62 = vsel %vm1468_vm0, %v4737_v58, 0 }
 0x263   : > { %3439 = vmatpush3.bf16.msra.mxu1 %v2262_v15  ;;  %v2100_v15 = vadd.s32 96, %v5158_v29 }
 0x264   : > { %3440 = vmatprep.subr.bf16.mxu1 %v2261_v2 }
 0x265   : > { %vm2116_vm13 = vcmp.le.s32.totalorder %v5157_v26, %v2100_v15 }
 0x267   : > { %3441 = vmatpush3.bf16.msra.mxu1 %v2261_v2 }
 0x268   : > { %3413 = vmatpush3.bf16.xpose.msra.mxu0 %v1985_v31  ;;  %3442 = vmatprep.subr.bf16.mxu1 %v2260_v38  ;;  %v2102_v31 = vadd.s32 112, %v5158_v29 }
 0x269   : > { %3489 = vmatprep.subr.msk.bf16.mxu0 %vm1468_vm0, %v4737_v58  ;;  %v1976_v58 = vsel %vm1468_vm0, %v4721_v35, 0 }
 0x26a   : > { %vm2118_vm14 = vcmp.le.s32.totalorder %v5157_v26, %v2102_v31 }
 0x26b   : > { %3443 = vmatpush3.bf16.msra.mxu1 %v2260_v38 }
 0x26c   : > { %3444 = vmatprep.subr.bf16.mxu1 %v2259_v23 }
 0x26f   : > { %3445 = vmatpush3.bf16.msra.mxu1 %v2259_v23  ;;  %v2103_v23 = vadd.s32 120, %v5158_v29 }
 0x270   : > { %3415 = vmatpush3.bf16.xpose.msra.mxu0 %v1982_v62  ;;  %3446 = vmatprep.subr.bf16.mxu1 %v2258_v11 }
 0x271   : > { %3490 = vmatprep.subr.msk.bf16.mxu0 %vm1468_vm0, %v4729_v14  ;;  %v5141_v14 = vpack.c.bf16 %v4547_v7, %v4552_v0  ;;  %v5154_v0 = vpack.c.bf16 %v4689_v51, %v4698_v22  ;;  %v5159_v51 = vld [vmem:[#allocation21_spill] sm:$0xff] }
 0x272   : > { %vm2107_vm3 = vcmp.le.s32.totalorder %v5157_v26, %v5159_v51 }
 0x273   : > { %3447 = vmatpush3.bf16.msra.mxu1 %v2258_v11 }
 0x274   : > { %3448 = vmatprep.subr.bf16.mxu1 %v4755_v41 }
 0x277   : > { %3449 = vmatpush3.bf16.msra.mxu1 %v4755_v41  ;;  %v5146_v41 = vld [vmem:[#allocation27_spill] sm:$0xff] }
 0x278   : > { %3417 = vmatpush3.bf16.xpose.msra.mxu0 %v1979_v63  ;;  %3450 = vmatprep.subr.bf16.mxu1 %v4743_v40  ;;  %v5147_v19 = vpack.c.bf16 %v5145_v53, %v5146_v41 }
 0x279   : > { %3491 = vmatprep.subr.msk.bf16.mxu0 %vm1468_vm0, %v4721_v35  ;;  %v5149_v35 = vld [vmem:[#allocation29_spill] sm:$0xff] }
 0x27a   : > { %v5150_v18 = vpack.c.bf16 %v5148_v30, %v5149_v35 }
 0x27b   : > { %3451 = vmatpush3.bf16.msra.mxu1 %v4743_v40  ;;  %v5151_v40 = vld [vmem:[#allocation30_spill] sm:$0xff] }
 0x27c   : > { %v5153_v7 = vpack.c.bf16 %v5151_v40, %v5152_v37 }
 0x280   : > { %3419 = vmatpush3.bf16.xpose.msra.mxu0 %v1976_v58 }
 0x287   : > { %3421 = vmatmul.mubr.msk.bf16.vlgmr.msra.gmra.mxu0 %vm1468_vm0, %v5141_v14 }
 0x288   : > { %3424 = vmatprep.mubr.msk.bf16.mxu0 %vm1468_vm0, %v5144_v60 }
 0x28f   : > { %3425 = vmatmul.mubr.msk.bf16.gmra.mxu0 %vm1468_vm0, %v5147_v19 }
 0x290   : > { %3428 = vmatprep.mubr.msk.bf16.mxu0 %vm1468_vm0, %v5150_v18 }
 0x297   : > { %3429 = vmatmul.mubr.msk.bf16.gmra.mxu0 %vm1468_vm0, %v5153_v7 }
 0x298   : > { %3432 = vmatprep.mubr.msk.bf16.mxu0 %vm1468_vm0, %v5154_v0 }
 0x29f   : > { %3433 = vmatmul.mubr.msk.bf16.gmra.mxu0 %vm1468_vm0, %v5155_v55 }
 0x347   : > { %v3422_v17 = vpop.f32.mrf.mxu0 }
 0x348   : > { %v4849_v54 = vsel %vm2106_vm1, %v3422_v17, -1e+30  ;;  %vm2119_vm1 = vcmp.le.s32.totalorder %v5157_v26, %v2103_v23 }
 0x349   : > { %2140 = vmax.xlane.f32.xlu1 %v4849_v54  ;;  %v2033_v52 = vpop.f32.mrf.mxu0 }
 0x34a   : > { %v4854_v22 = vsel %vm2104_vm2, %v2033_v52, -1e+30 }
 0x34b   : > { %2136 = vmax.xlane.f32.xlu0 %v4854_v22  ;;  %v3423_v39 = vpop.f32.mrf.mxu0 }
 0x34c   : > { %v4859_v59 = vsel %vm2107_vm3, %v3423_v39, -1e+30 }
 0x34d   : > { %2142 = vmax.xlane.f32.xlu1 %v4859_v59  ;;  %v2036_v44 = vpop.f32.mrf.mxu0 }
 0x34e   : > { %v4862_v43 = vsel %vm2105_vm4, %v2036_v44, -1e+30 }
 0x34f   : > { %2138 = vmax.xlane.f32.xlu0 %v4862_v43  ;;  %v3426_v16 = vpop.f32.mrf.mxu0 }
 0x350   : > { %v4875_v33 = vsel %vm2110_vm6, %v3426_v16, -1e+30 }
 0x351   : > { %v2049_v13 = vpop.f32.mrf.mxu0 }
 0x352   : > { %v4867_v42 = vsel %vm2108_vm5, %v2049_v13, -1e+30 }
 0x353   : > { %2144 = vmax.xlane.f32.xlu0 %v4867_v42  ;;  %v3427_v36 = vpop.f32.mrf.mxu0 }
 0x354   : > { %v4886_v57 = vsel %vm2111_vm8, %v3427_v36, -1e+30 }
 0x355   : > { %v2052_v28 = vpop.f32.mrf.mxu0 }
 0x356   : > { %v4877_v1 = vsel %vm2109_vm7, %v2052_v28, -1e+30 }
 0x357   : > { %2148 = vmax.xlane.f32.xlu0 %v4875_v33  ;;  %2146 = vmax.xlane.f32.xlu1 %v4877_v1  ;;  %v3430_v47 = vpop.f32.mrf.mxu0 }
 0x358   : > { %v4896_v12 = vsel %vm2114_vm10, %v3430_v47, -1e+30 }
 0x359   : > { %v2065_v50 = vpop.f32.mrf.mxu0 }
 0x35a   : > { %v4888_v49 = vsel %vm2112_vm9, %v2065_v50, -1e+30 }
 0x35b   : > { %2150 = vmax.xlane.f32.xlu1 %v4886_v57  ;;  %2152 = vmax.xlane.f32.xlu0 %v4888_v49  ;;  %v3431_v4 = vpop.f32.mrf.mxu0 }
 0x35c   : > { %v4906_v38 = vsel %vm2115_vm12, %v3431_v4, -1e+30 }
 0x35d   : > { %v2068_v27 = vpop.f32.mrf.mxu0 }
 0x35e   : > { %v4898_v61 = vsel %vm2113_vm11, %v2068_v27, -1e+30 }
 0x35f   : > { %2156 = vmax.xlane.f32.xlu0 %v4896_v12  ;;  %2154 = vmax.xlane.f32.xlu1 %v4898_v61  ;;  %v3434_v2 = vpop.f32.mrf.mxu0 }
 0x360   : > { %v4915_v11 = vsel %vm2118_vm14, %v3434_v2, -1e+30 }
 0x361   : > { %v2081_v34 = vpop.f32.mrf.mxu0 }
 0x362   : > { %v4908_v45 = vsel %vm2116_vm13, %v2081_v34, -1e+30 }
 0x363   : > { %2158 = vmax.xlane.f32.xlu1 %v4906_v38  ;;  %2160 = vmax.xlane.f32.xlu0 %v4908_v45  ;;  %v3435_v9 = vpop.f32.mrf.mxu0 }
 0x364   : > { %v4922_v58 = vsel %vm2119_vm1, %v3435_v9, -1e+30 }
 0x365   : > { %v2084_v62 = vpop.f32.mrf.mxu0 }
 0x366   : > { %v4917_v63 = vsel %vm2117_vm15, %v2084_v62, -1e+30 }
 0x367   : > { %2164 = vmax.xlane.f32.xlu0 %v4915_v11  ;;  %2162 = vmax.xlane.f32.xlu1 %v4917_v63 }
 0x36b   : > { %2166 = vmax.xlane.f32.xlu1 %v4922_v58 }
 0x3d2   : > { %v2141_v14 = vpop.xlane.xlu1 %2140 }
 0x3d3   : > { %v2170_v56 = vsub.f32 %v4849_v54, %v2141_v14 }
 0x3d4   : > { %v2137_v25 = vpop.xlane.xlu0 %2136 }
 0x3d5   : > { %v2168_v60 = vsub.f32 %v4854_v22, %v2137_v25  ;;  %v2188_v41 = vmul.f32 1.442695, %v2170_v56 }
 0x3d6   : > { %v2143_v53 = vpop.xlane.xlu1 %2142 }
 0x3d7   : > { %v2184_v19 = vmul.f32 1.442695, %v2168_v60  ;;  %v2171_v30 = vsub.f32 %v4859_v59, %v2143_v53 }
 0x3d8   : > { %v2139_v35 = vpop.xlane.xlu0 %2138 }
 0x3d9   : > { %3652 = vpow2.f32 %v2184_v19  ;;  %v2190_v18 = vmul.f32 1.442695, %v2171_v30  ;;  %v2169_v40 = vsub.f32 %v4862_v43, %v2139_v35  ;;  %v3640_v35 = vld [vmem:[%s3968_s15 + $0x30] ss:$8 sps:$4 sm:$0xff]  }
 0x3da   : > { %3654 = vpow2.f32 %v2188_v41 }
 0x3db   : > { %v2186_v37 = vmul.f32 1.442695, %v2169_v40  ;;  %3656 = vpow2.f32 %v2190_v18  ;;  %v3642_v18 = vld [vmem:[%s3968_s15 + $0x34] ss:$8 sps:$4 sm:$0xff]   ;;  %v3645_v40 = vld [vmem:[%s3968_s15 + $0x24] ss:$8 sps:$4 sm:$0xff]  }
 0x3dc   : > { %v2145_v7 = vpop.xlane.xlu0 %2144  ;;  %2513 = vmatprep.subr.bf16.mxu0 %v3642_v18 }
 0x3dd   : > { %3658 = vpow2.f32 %v2186_v37  ;;  %v2172_v0 = vsub.f32 %v4867_v42, %v2145_v7  ;;  %2514 = vmatpush1.bf16.msra.mxu0 %v3640_v35  ;;  %v3643_v37 = vld [vmem:[%s3968_s15 + $0x20] ss:$8 sps:$4 sm:$0xff]   ;;  %v3648_v7 = vld [vmem:[%s3968_s15 + $0x14] ss:$8 sps:$4 sm:$0xff]  }
 0x3de   : > { %2515 = vmatprep.subr.bf16.mxu0 %v3645_v40 }
 0x3df   : > { %v2192_v55 = vmul.f32 1.442695, %v2172_v0  ;;  %v3646_v0 = vld [vmem:[%s3968_s15 + $0x10] ss:$8 sps:$4 sm:$0xff]  }
 0x3e0   : > { %v2149_v3 = vpop.xlane.xlu0 %2148  ;;  %v2147_v26 = vpop.xlane.xlu1 %2146 }
 0x3e1   : > { %3660 = vpow2.f32 %v2192_v55  ;;  %v2174_v17 = vsub.f32 %v4875_v33, %v2149_v3  ;;  %v2173_v29 = vsub.f32 %v4877_v1, %v2147_v26  ;;  %2516 = vmatpush1.bf16.msra.mxu0 %v3643_v37  ;;  %v3649_v55 = vld [vmem:[%s3968_s15] ss:$8 sps:$4 sm:$0xff]   ;;  %v3651_v3 = vld [vmem:[%s3968_s15 + $0x4] ss:$8 sps:$4 sm:$0xff]   ;;  %v3812_v26 = vmov 0  }
 0x3e2   : > { %2517 = vmatprep.subr.bf16.mxu0 %v3648_v7  ;;  %2537 = vmatprep.mubr.bf16.mxu0 %v3812_v26 }
 0x3e3   : > { %v2196_v54 = vmul.f32 1.442695, %v2174_v17  ;;  %v2194_v52 = vmul.f32 1.442695, %v2173_v29 }
 0x3e4   : > { %v2151_v51 = vpop.xlane.xlu1 %2150  ;;  %v2153_v22 = vpop.xlane.xlu0 %2152 }
 0x3e5   : > { %3662 = vpow2.f32 %v2196_v54  ;;  %v2175_v39 = vsub.f32 %v4886_v57, %v2151_v51  ;;  %v2176_v10 = vsub.f32 %v4888_v49, %v2153_v22  ;;  %2518 = vmatpush1.bf16.msra.mxu0 %v3646_v0 }
 0x3e6   : > { %v3653_v59 = vpop.eup %3652  ;;  %3664 = vpow2.f32 %v2194_v52  ;;  %2519 = vmatprep.subr.bf16.mxu0 %v3651_v3 }
 0x3e7   : > { %v2198_v44 = vmul.f32 1.442695, %v2175_v39  ;;  %v2200_v43 = vmul.f32 1.442695, %v2176_v10  ;;  %2216 = vadd.xlane.f32.xlu0 %v3653_v59  ;;  %v3655_v16 = vpop.eup %3654 }
 0x3e8   : > { %v2157_v5 = vpop.xlane.xlu0 %2156  ;;  %v2155_v13 = vpop.xlane.xlu1 %2154 }
 0x3e9   : > { %v3657_v42 = vpop.eup %3656  ;;  %3666 = vpow2.f32 %v2198_v44  ;;  %v2178_v36 = vsub.f32 %v4896_v12, %v2157_v5  ;;  %v2177_v20 = vsub.f32 %v4898_v61, %v2155_v13  ;;  %2520 = vmatpush1.bf16.msra.mxu0 %v3649_v55 }
 0x3ea   : > { %v3659_v32 = vpop.eup %3658  ;;  %3668 = vpow2.f32 %v2200_v43  ;;  %v2249_v6 = vpack.c.bf16 %v3657_v42, %v3655_v16 }
 0x3eb   : > { %v2204_v21 = vmul.f32 1.442695, %v2178_v36  ;;  %v2202_v28 = vmul.f32 1.442695, %v2177_v20  ;;  %2220 = vadd.xlane.f32.xlu0 %v3655_v16  ;;  %2218 = vadd.xlane.f32.xlu1 %v3659_v32  ;;  %v2248_v33 = vpack.c.bf16 %v3659_v32, %v3653_v59 }
 0x3ec   : > { %v2159_v1 = vpop.xlane.xlu1 %2158  ;;  %v2161_v47 = vpop.xlane.xlu0 %2160 }
 0x3ed   : > { %3670 = vpow2.f32 %v2204_v21  ;;  %v2179_v46 = vsub.f32 %v4906_v38, %v2159_v1  ;;  %v2180_v48 = vsub.f32 %v4908_v45, %v2161_v47  ;;  %3452 = vmatprep.mubr.bf16.mxu1 %v2248_v33 }
 0x3ee   : > { %v3661_v50 = vpop.eup %3660  ;;  %3672 = vpow2.f32 %v2202_v28  ;;  %3453 = vmatmul.mubr.bf16.vlgmr.msra.gmra.mxu1 %v2249_v6 }
 0x3ef   : > { %v2206_v57 = vmul.f32 1.442695, %v2179_v46  ;;  %v2208_v49 = vmul.f32 1.442695, %v2180_v48  ;;  %2224 = vadd.xlane.f32.xlu0 %v3661_v50  ;;  %2222 = vadd.xlane.f32.xlu1 %v3657_v42 }
 0x3f0   : > { %v2165_v4 = vpop.xlane.xlu0 %2164  ;;  %v2163_v8 = vpop.xlane.xlu1 %2162 }
 0x3f1   : > { %3674 = vpow2.f32 %v2206_v57  ;;  %v2182_v15 = vsub.f32 %v4915_v11, %v2165_v4  ;;  %v2181_v27 = vsub.f32 %v4917_v63, %v2163_v8 }
 0x3f2   : > { %v3663_v12 = vpop.eup %3662  ;;  %3676 = vpow2.f32 %v2208_v49 }
 0x3f3   : > { %v3665_v61 = vpop.eup %3664  ;;  %v2212_v2 = vmul.f32 1.442695, %v2182_v15  ;;  %v2210_v31 = vmul.f32 1.442695, %v2181_v27  ;;  %2228 = vadd.xlane.f32.xlu0 %v3663_v12 }
 0x3f4   : > { %2226 = vadd.xlane.f32.xlu1 %v3665_v61  ;;  %v2167_v24 = vpop.xlane.xlu1 %2166  ;;  %v2250_v34 = vpack.c.bf16 %v3665_v61, %v3661_v50 }
 0x3f5   : > { %3678 = vpow2.f32 %v2212_v2  ;;  %v2183_v38 = vsub.f32 %v4922_v58, %v2167_v24 }
 0x3f6   : > { %v3667_v45 = vpop.eup %3666  ;;  %3680 = vpow2.f32 %v2210_v31  ;;  %3456 = vmatprep.mubr.bf16.mxu1 %v2250_v34 }
 0x3f7   : > { %v3669_v9 = vpop.eup %3668  ;;  %v2214_v23 = vmul.f32 1.442695, %v2183_v38  ;;  %v2251_v62 = vpack.c.bf16 %v3667_v45, %v3663_v12 }
 0x3f8   : > { %2232 = vadd.xlane.f32.xlu0 %v3669_v9  ;;  %2230 = vadd.xlane.f32.xlu1 %v3667_v45 }
 0x3f9   : > { %3682 = vpow2.f32 %v2214_v23  ;;  %3457 = vmatmul.mubr.bf16.gmra.mxu1 %v2251_v62 }
 0x3fa   : > { %v3671_v11 = vpop.eup %3670 }
 0x3fb   : > { %v3673_v63 = vpop.eup %3672 }
 0x3fc   : > { %2236 = vadd.xlane.f32.xlu0 %v3671_v11  ;;  %2234 = vadd.xlane.f32.xlu1 %v3673_v63  ;;  %v2252_v14 = vpack.c.bf16 %v3673_v63, %v3669_v9 }
 0x3fe   : > { %v3675_v56 = vpop.eup %3674  ;;  %3460 = vmatprep.mubr.bf16.mxu1 %v2252_v14 }
 0x3ff   : > { %v3677_v25 = vpop.eup %3676  ;;  %v2253_v58 = vpack.c.bf16 %v3675_v56, %v3671_v11 }
 0x400   : > { %2240 = vadd.xlane.f32.xlu0 %v3677_v25  ;;  %2238 = vadd.xlane.f32.xlu1 %v3675_v56 }
 0x401   : > { %3461 = vmatmul.mubr.bf16.gmra.mxu1 %v2253_v58 }
 0x402   : > { %v3679_v60 = vpop.eup %3678 }
 0x403   : > { %v3681_v53 = vpop.eup %3680 }
 0x404   : > { %2244 = vadd.xlane.f32.xlu0 %v3679_v60  ;;  %2242 = vadd.xlane.f32.xlu1 %v3681_v53  ;;  %v2254_v41 = vpack.c.bf16 %v3681_v53, %v3677_v25 }
 0x406   : > { %v3683_v19 = vpop.eup %3682  ;;  %3464 = vmatprep.mubr.bf16.mxu1 %v2254_v41 }
 0x407   : > { %v2255_v30 = vpack.c.bf16 %v3683_v19, %v3679_v60 }
 0x408   : > { %2246 = vadd.xlane.f32.xlu1 %v3683_v19 }
 0x409   : > { %3465 = vmatmul.mubr.bf16.gmra.mxu1 %v2255_v30 }
 0x470   : > { %v2217_v17 = vpop.xlane.xlu0 %2216 }
 0x471   : > { %3684 = vrcp.f32 %v2217_v17 }
 0x474   : > { %v2219_v29 = vpop.xlane.xlu1 %2218  ;;  %v2221_v52 = vpop.xlane.xlu0 %2220 }
 0x475   : > { %3686 = vrcp.f32 %v2219_v29 }
 0x478   : > { %v2223_v54 = vpop.xlane.xlu1 %2222  ;;  %v2225_v43 = vpop.xlane.xlu0 %2224 }
 0x479   : > { %3688 = vrcp.f32 %v2223_v54 }
 0x47a   : > { %3690 = vrcp.f32 %v2221_v52 }
 0x47c   : > { %v2229_v1 = vpop.xlane.xlu0 %2228 }
 0x47d   : > { %v2227_v39 = vpop.xlane.xlu1 %2226 }
 0x47e   : > { %v3685_v59 = vpop.eup %3684  ;;  %3692 = vrcp.f32 %v2227_v39 }
 0x47f   : > { %3694 = vrcp.f32 %v2225_v43 }
 0x481   : > { %v2231_v32 = vpop.xlane.xlu1 %2230  ;;  %v2233_v8 = vpop.xlane.xlu0 %2232 }
 0x482   : > { %v3687_v44 = vpop.eup %3686  ;;  %3696 = vrcp.f32 %v2231_v32  ;;  %v2396_v32 = vld [vmem:[#allocation2 + $0x18] sm:$0xff] }
 0x483   : > { %3698 = vrcp.f32 %v2229_v1 }
 0x485   : > { %v2235_v57 = vpop.xlane.xlu1 %2234  ;;  %v2237_v38 = vpop.xlane.xlu0 %2236 }
 0x486   : > { %v3689_v20 = vpop.eup %3688  ;;  %3700 = vrcp.f32 %v2235_v57 }
 0x487   : > { %v3691_v33 = vpop.eup %3690  ;;  %3702 = vrcp.f32 %v2233_v8 }
 0x489   : > { %v2239_v31 = vpop.xlane.xlu1 %2238  ;;  %v2241_v25 = vpop.xlane.xlu0 %2240 }
 0x48a   : > { %3704 = vrcp.f32 %v2239_v31 }
 0x48b   : > { %v3693_v50 = vpop.eup %3692  ;;  %3706 = vrcp.f32 %v2237_v38 }
 0x48c   : > { %v3695_v4 = vpop.eup %3694 }
 0x48d   : > { %v2243_v63 = vpop.xlane.xlu1 %2242  ;;  %v2245_v40 = vpop.xlane.xlu0 %2244 }
 0x48e   : > { %3708 = vrcp.f32 %v2243_v63 }
 0x48f   : > { %v3697_v2 = vpop.eup %3696  ;;  %3710 = vrcp.f32 %v2241_v25 }
 0x490   : > { %v3699_v34 = vpop.eup %3698 }
 0x491   : > { %v2247_v30 = vpop.xlane.xlu1 %2246 }
 0x492   : > { %3712 = vrcp.f32 %v2247_v30 }
 0x493   : > { %v3701_v11 = vpop.eup %3700  ;;  %3714 = vrcp.f32 %v2245_v40 }
 0x494   : > { %v3703_v56 = vpop.eup %3702 }
 0x497   : > { %v3705_v19 = vpop.eup %3704 }
 0x498   : > { %v3707_v18 = vpop.eup %3706 }
 0x49b   : > { %v3709_v3 = vpop.eup %3708 }
 0x49c   : > { %v3711_v29 = vpop.eup %3710 }
 0x4ae   : > { %v3454_v51 = vpop.f32.mrf.mxu1 }
 0x4af   : > { %v2379_v47 = vmul.f32 %v3691_v33, %v3454_v51  ;;  %v3713_v51 = vpop.eup %3712 }
 0x4b0   : > { %v2298_v22 = vpop.f32.mrf.mxu1  ;;  %v3715_v39 = vpop.eup %3714 }
 0x4b1   : > { %v2377_v5 = vmul.f32 %v3685_v59, %v2298_v22 }
 0x4b2   : > { %v3455_v10 = vpop.f32.mrf.mxu1 }
 0x4b3   : > { %v2380_v21 = vmul.f32 %v3689_v20, %v3455_v10 }
 0x4b4   : > { %v2301_v16 = vpop.f32.mrf.mxu1 }
 0x4b5   : > { %v2378_v13 = vmul.f32 %v3687_v44, %v2301_v16  ;;  %v2426_v46 = vpack.c.bf16 %v2380_v21, %v2379_v47  ;;  %v2393_v44 = vld [vmem:[#allocation2 + $0xb0] sm:$0xff]  ;;  %v2394_v16 = vld [vmem:[#allocation2] sm:$0xff]  ;;  %v2398_v47 = vld [vmem:[#allocation2 + $0x68] sm:$0xff] }
 0x4b7   : > { %v2425_v42 = vpack.c.bf16 %v2378_v13, %v2377_v5 }
 0x4b9   : > { %v3458_v36 = vpop.f32.mrf.mxu1  ;;  %3032 = vmatmul.mubr.msk.bf16.vlgmr.msra.gmra.mxu0 %vm1468_vm0, %v2425_v42  ;;  %v2395_v42 = vld [vmem:[#allocation2 + $0xd8] sm:$0xff] }
 0x4ba   : > { %2547 = vmatprep.mubr.bf16.mxu0 %v3812_v26  ;;  %v2383_v9 = vmul.f32 %v3699_v34, %v3458_v36 }
 0x4bb   : > { %v2314_v28 = vpop.f32.mrf.mxu1 }
 0x4bc   : > { %v2381_v27 = vmul.f32 %v3695_v4, %v2314_v28 }
 0x4bd   : > { %v3459_v6 = vpop.f32.mrf.mxu1 }
 0x4be   : > { %v2384_v24 = vmul.f32 %v3697_v2, %v3459_v6 }
 0x4bf   : > { %v2317_v48 = vpop.f32.mrf.mxu1 }
 0x4c0   : > { %v2382_v49 = vmul.f32 %v3693_v50, %v2317_v48  ;;  %v2428_v23 = vpack.c.bf16 %v2384_v24, %v2383_v9  ;;  %v2399_v48 = vld [vmem:[#allocation2 + $0x30] sm:$0xff]  ;;  %v2403_v24 = vld [vmem:[#allocation2 + $0xe8] sm:$0xff] }
 0x4c1   : > { %3033 = vmatmul.mubr.msk.bf16.gmra.mxu0 %vm1468_vm0, %v2426_v46  ;;  %v3462_v15 = vpop.f32.mrf.mxu1 }
 0x4c2   : > { %2557 = vmatprep.mubr.bf16.mxu0 %v3812_v26  ;;  %v2427_v12 = vpack.c.bf16 %v2382_v49, %v2381_v27  ;;  %v2387_v7 = vmul.f32 %v3707_v18, %v3462_v15  ;;  %v2400_v49 = vld [vmem:[#allocation2 + $0x48] sm:$0xff]  ;;  %v2401_v15 = vld [vmem:[#allocation2 + $0x80] sm:$0xff] }
 0x4c3   : > { %v2330_v61 = vpop.f32.mrf.mxu1 }
 0x4c4   : > { %v2385_v60 = vmul.f32 %v3703_v56, %v2330_v61  ;;  %v2402_v61 = vld [vmem:[#allocation2 + $0x88] sm:$0xff] }
 0x4c5   : > { %v3463_v45 = vpop.f32.mrf.mxu1 }
 0x4c6   : > { %v2388_v35 = vmul.f32 %v3705_v19, %v3463_v45  ;;  %v2404_v45 = vld [vmem:[#allocation2 + $0xb8] sm:$0xff] }
 0x4c7   : > { %v2333_v62 = vpop.f32.mrf.mxu1 }
 0x4c8   : > { %v2386_v14 = vmul.f32 %v3701_v11, %v2333_v62  ;;  %v2430_v0 = vpack.c.bf16 %v2388_v35, %v2387_v7  ;;  %v2405_v62 = vld [vmem:[#allocation2 + $0x60] sm:$0xff]  ;;  %v2409_v35 = vld [vmem:[#allocation2 + $0x38] sm:$0xff] }
 0x4c9   : > { %3034 = vmatmul.mubr.msk.bf16.gmra.mxu0 %vm1468_vm0, %v2427_v12  ;;  %v3466_v58 = vpop.f32.mrf.mxu1 }
 0x4ca   : > { %2567 = vmatprep.mubr.bf16.mxu0 %v3812_v26  ;;  %v2429_v53 = vpack.c.bf16 %v2386_v14, %v2385_v60  ;;  %v2391_v10 = vmul.f32 %v3715_v39, %v3466_v58  ;;  %v2406_v14 = vld [vmem:[#allocation2 + $0xf0] sm:$0xff]  ;;  %v2407_v58 = vld [vmem:[#allocation2 + $0x8] sm:$0xff] }
 0x4cb   : > { %v2346_v41 = vpop.f32.mrf.mxu1 }
 0x4cc   : > { %v2389_v54 = vmul.f32 %v3711_v29, %v2346_v41  ;;  %v2408_v41 = vld [vmem:[#allocation2 + $0x78] sm:$0xff]  ;;  %v2412_v29 = vld [vmem:[#allocation2 + $0xc8] sm:$0xff] }
 0x4cd   : > { %v3467_v37 = vpop.f32.mrf.mxu1 }
 0x4ce   : > { %v2392_v22 = vmul.f32 %v3713_v51, %v3467_v37  ;;  %v2410_v37 = vld [vmem:[#allocation2 + $0x58] sm:$0xff]  ;;  %v2413_v51 = vld [vmem:[#allocation2 + $0xe0] sm:$0xff] }
 0x4cf   : > { %v2349_v55 = vpop.f32.mrf.mxu1 }
 0x4d0   : > { %v2390_v17 = vmul.f32 %v3709_v3, %v2349_v55  ;;  %v2432_v59 = vpack.c.bf16 %v2392_v22, %v2391_v10  ;;  %v2411_v55 = vld [vmem:[#allocation2 + $0x40] sm:$0xff]  ;;  %v2414_v10 = vld [vmem:[#allocation2 + $0x90] sm:$0xff] }
 0x4d1   : > { %3035 = vmatmul.mubr.msk.bf16.gmra.mxu0 %vm1468_vm0, %v2428_v23 }
 0x4d2   : > { %2577 = vmatprep.mubr.bf16.mxu0 %v3812_v26  ;;  %v2431_v52 = vpack.c.bf16 %v2390_v17, %v2389_v54 }
 0x4d9   : > { %3036 = vmatmul.mubr.msk.bf16.gmra.mxu0 %vm1468_vm0, %v2429_v53 }
 0x4da   : > { %2587 = vmatprep.mubr.bf16.mxu0 %v3812_v26 }
 0x4e1   : > { %3037 = vmatmul.mubr.msk.bf16.gmra.mxu0 %vm1468_vm0, %v2430_v0 }
 0x4e2   : > { %2597 = vmatprep.mubr.bf16.mxu0 %v3812_v26 }
 0x4e9   : > { %3038 = vmatmul.mubr.msk.bf16.gmra.mxu0 %vm1468_vm0, %v2431_v52 }
 0x4ea   : > { %2607 = vmatprep.mubr.bf16.mxu0 %v3812_v26  ;;  %v2397_v26 = vld [vmem:[#allocation2 + $0x50] sm:$0xff] }
 0x4f1   : > { %3039 = vmatmul.mubr.msk.bf16.gmra.mxu0 %vm1468_vm0, %v2432_v59 }
 0x579   : > { %v2539_v43 = vpop.f32.mrf.mxu0 }
 0x57a   : > { %v2618_v5 = vadd.f32 %v2539_v43, %v2393_v44  ;;  %v2415_v43 = vld [vmem:[#allocation2 + $0x70] sm:$0xff] }
 0x57b   : > { %v2541_v13 = vpop.f32.mrf.mxu0 }
 0x57c   : > { %2650 = vst [vmem:[#allocation2 + $0xb0] sm:$0xff] %v2618_v5  ;;  %v2619_v36 = vadd.f32 %v2541_v13, %v2394_v16  ;;  %v2416_v13 = vld [vmem:[#allocation2 + $0xc0] sm:$0xff] }
 0x57d   : > { %v2543_v20 = vpop.f32.mrf.mxu0 }
 0x57e   : > { %2651 = vst [vmem:[#allocation2] sm:$0xff] %v2619_v36  ;;  %v2620_v21 = vadd.f32 %v2543_v20, %v2395_v42  ;;  %v2417_v20 = vld [vmem:[#allocation2 + $0xa8] sm:$0xff] }
 0x57f   : > { %v2545_v28 = vpop.f32.mrf.mxu0 }
 0x580   : > { %2652 = vst [vmem:[#allocation2 + $0xd8] sm:$0xff] %v2620_v21  ;;  %v2621_v33 = vadd.f32 %v2545_v28, %v2396_v32  ;;  %v2418_v28 = vld [vmem:[#allocation2 + $0xd0] sm:$0xff] }
 0x581   : > { %v2549_v1 = vpop.f32.mrf.mxu0 }
 0x582   : > { %2653 = vst [vmem:[#allocation2 + $0x18] sm:$0xff] %v2621_v33  ;;  %v2622_v6 = vadd.f32 %v2549_v1, %v2397_v26  ;;  %v2419_v1 = vld [vmem:[#allocation2 + $0x10] sm:$0xff] }
 0x583   : > { %v2551_v46 = vpop.f32.mrf.mxu0 }
 0x584   : > { %2654 = vst [vmem:[#allocation2 + $0x50] sm:$0xff] %v2622_v6  ;;  %v2623_v50 = vadd.f32 %v2551_v46, %v2398_v47  ;;  %v2420_v46 = vld [vmem:[#allocation2 + $0x28] sm:$0xff] }
 0x585   : > { %v2553_v57 = vpop.f32.mrf.mxu0 }
 0x586   : > { %2655 = vst [vmem:[#allocation2 + $0x68] sm:$0xff] %v2623_v50  ;;  %v2624_v4 = vadd.f32 %v2553_v57, %v2399_v48  ;;  %v2421_v57 = vld [vmem:[#allocation2 + $0xa0] sm:$0xff] }
 0x587   : > { %v2555_v8 = vpop.f32.mrf.mxu0 }
 0x588   : > { %2656 = vst [vmem:[#allocation2 + $0x30] sm:$0xff] %v2624_v4  ;;  %v2625_v27 = vadd.f32 %v2555_v8, %v2400_v49  ;;  %v2422_v8 = vld [vmem:[#allocation2 + $0xf8] sm:$0xff] }
 0x589   : > { %v2559_v12 = vpop.f32.mrf.mxu0 }
 0x58a   : > { %2657 = vst [vmem:[#allocation2 + $0x48] sm:$0xff] %v2625_v27  ;;  %v2626_v2 = vadd.f32 %v2559_v12, %v2401_v15  ;;  %v2423_v12 = vld [vmem:[#allocation2 + $0x20] sm:$0xff] }
 0x58b   : > { %v2561_v31 = vpop.f32.mrf.mxu0 }
 0x58c   : > { %2658 = vst [vmem:[#allocation2 + $0x80] sm:$0xff] %v2626_v2  ;;  %v2627_v34 = vadd.f32 %v2561_v31, %v2402_v61  ;;  %v2424_v31 = vld [vmem:[#allocation2 + $0x98] sm:$0xff] }
 0x58d   : > { %v2563_v38 = vpop.f32.mrf.mxu0 }
 0x58e   : > { %2659 = vst [vmem:[#allocation2 + $0x88] sm:$0xff] %v2627_v34  ;;  %v2628_v9 = vadd.f32 %v2563_v38, %v2403_v24 }
 0x58f   : > { %v2565_v23 = vpop.f32.mrf.mxu0 }
 0x590   : > { %2660 = vst [vmem:[#allocation2 + $0xe8] sm:$0xff] %v2628_v9  ;;  %v2629_v11 = vadd.f32 %v2565_v23, %v2404_v45 }
 0x591   : > { %v2569_v63 = vpop.f32.mrf.mxu0 }
 0x592   : > { %2661 = vst [vmem:[#allocation2 + $0xb8] sm:$0xff] %v2629_v11  ;;  %v2630_v56 = vadd.f32 %v2569_v63, %v2405_v62 }
 0x593   : > { %v2571_v25 = vpop.f32.mrf.mxu0 }
 0x594   : > { %2662 = vst [vmem:[#allocation2 + $0x60] sm:$0xff] %v2630_v56  ;;  %v2631_v60 = vadd.f32 %v2571_v25, %v2406_v14 }
 0x595   : > { %v2573_v53 = vpop.f32.mrf.mxu0 }
 0x596   : > { %2663 = vst [vmem:[#allocation2 + $0xf0] sm:$0xff] %v2631_v60  ;;  %v2632_v19 = vadd.f32 %v2573_v53, %v2407_v58 }
 0x597   : > { %v2575_v30 = vpop.f32.mrf.mxu0 }
 0x598   : > { %2664 = vst [vmem:[#allocation2 + $0x8] sm:$0xff] %v2632_v19  ;;  %v2633_v18 = vadd.f32 %v2575_v30, %v2408_v41 }
 0x599   : > { %v2579_v40 = vpop.f32.mrf.mxu0 }
 0x59a   : > { %2665 = vst [vmem:[#allocation2 + $0x78] sm:$0xff] %v2633_v18  ;;  %v2634_v7 = vadd.f32 %v2579_v40, %v2409_v35 }
 0x59b   : > { %v2581_v0 = vpop.f32.mrf.mxu0 }
 0x59c   : > { %2666 = vst [vmem:[#allocation2 + $0x38] sm:$0xff] %v2634_v7  ;;  %v2635_v3 = vadd.f32 %v2581_v0, %v2410_v37 }
 0x59d   : > { %v2583_v17 = vpop.f32.mrf.mxu0 }
 0x59e   : > { %2667 = vst [vmem:[#allocation2 + $0x58] sm:$0xff] %v2635_v3  ;;  %v2636_v54 = vadd.f32 %v2583_v17, %v2411_v55 }
 0x59f   : > { %v2585_v52 = vpop.f32.mrf.mxu0 }
 0x5a0   : > { %2668 = vst [vmem:[#allocation2 + $0x40] sm:$0xff] %v2636_v54  ;;  %v2637_v22 = vadd.f32 %v2585_v52, %v2412_v29 }
 0x5a1   : > { %v2589_v39 = vpop.f32.mrf.mxu0 }
 0x5a2   : > { %2669 = vst [vmem:[#allocation2 + $0xc8] sm:$0xff] %v2637_v22  ;;  %v2638_v59 = vadd.f32 %v2589_v39, %v2413_v51 }
 0x5a3   : > { %v2591_v44 = vpop.f32.mrf.mxu0 }
 0x5a4   : > { %2670 = vst [vmem:[#allocation2 + $0xe0] sm:$0xff] %v2638_v59  ;;  %v2639_v16 = vadd.f32 %v2591_v44, %v2414_v10 }
 0x5a5   : > { %v2593_v5 = vpop.f32.mrf.mxu0 }
 0x5a6   : > { %2671 = vst [vmem:[#allocation2 + $0x90] sm:$0xff] %v2639_v16  ;;  %v2640_v42 = vadd.f32 %v2593_v5, %v2415_v43 }
 0x5a7   : > { %v2595_v36 = vpop.f32.mrf.mxu0 }
 0x5a8   : > { %2672 = vst [vmem:[#allocation2 + $0x70] sm:$0xff] %v2640_v42  ;;  %v2641_v32 = vadd.f32 %v2595_v36, %v2416_v13 }
 0x5a9   : > { %v2599_v21 = vpop.f32.mrf.mxu0 }
 0x5aa   : > { %2673 = vst [vmem:[#allocation2 + $0xc0] sm:$0xff] %v2641_v32  ;;  %v2642_v26 = vadd.f32 %v2599_v21, %v2417_v20 }
 0x5ab   : > { %v2601_v33 = vpop.f32.mrf.mxu0 }
 0x5ac   : > { %2674 = vst [vmem:[#allocation2 + $0xa8] sm:$0xff] %v2642_v26  ;;  %v2643_v47 = vadd.f32 %v2601_v33, %v2418_v28 }
 0x5ad   : > { %v2603_v6 = vpop.f32.mrf.mxu0 }
 0x5ae   : > { %2675 = vst [vmem:[#allocation2 + $0xd0] sm:$0xff] %v2643_v47  ;;  %v2644_v48 = vadd.f32 %v2603_v6, %v2419_v1 }
 0x5af   : > { %v2605_v50 = vpop.f32.mrf.mxu0 }
 0x5b0   : > { %2676 = vst [vmem:[#allocation2 + $0x10] sm:$0xff] %v2644_v48  ;;  %v2645_v49 = vadd.f32 %v2605_v50, %v2420_v46 }
 0x5b1   : > { %v2609_v4 = vpop.f32.mrf.mxu0 }
 0x5b2   : > { %2677 = vst [vmem:[#allocation2 + $0x28] sm:$0xff] %v2645_v49  ;;  %v2646_v15 = vadd.f32 %v2609_v4, %v2421_v57 }
 0x5b3   : > { %v2611_v27 = vpop.f32.mrf.mxu0 }
 0x5b4   : > { %2678 = vst [vmem:[#allocation2 + $0xa0] sm:$0xff] %v2646_v15  ;;  %v2647_v61 = vadd.f32 %v2611_v27, %v2422_v8 }
 0x5b5   : > { %v2613_v2 = vpop.f32.mrf.mxu0 }
 0x5b6   : > { %2679 = vst [vmem:[#allocation2 + $0xf8] sm:$0xff] %v2647_v61  ;;  %v2648_v24 = vadd.f32 %v2613_v2, %v2423_v12  ;;  %2685 = sbr.rel (%p3040_p1) target bundleno = 1484 (0x5cc), region = 60 }
 0x5b7   : > { %v2615_v34 = vpop.f32.mrf.mxu0 }
 0x5b8   : > { %2680 = vst [vmem:[#allocation2 + $0x20] sm:$0xff] %v2648_v24  ;;  %v2649_v38 = vadd.f32 %v2615_v34, %v2424_v31 }
 0x5ba   : > { %2681 = vst [vmem:[#allocation2 + $0x98] sm:$0xff] %v2649_v38 }
 0x5bb   : > { %v2686_v45 = vld [vmem:[#allocation2 + $0xb0] sm:$0xff]  ;;  %v2687_v9 = vld [vmem:[#allocation2] sm:$0xff]  ;;  %v2688_v23 = vld [vmem:[#allocation2 + $0xd8] sm:$0xff] }
 0x5bc   : > { %2718 = vst [vmem:[%s3970_s16] sm:$0xff] %v2686_v45  ;;  %2719 = vst [vmem:[%s3970_s16 + $0x8] sm:$0xff] %v2687_v9  ;;  %v2689_v62 = vld [vmem:[#allocation2 + $0x18] sm:$0xff]  ;;  %v2690_v11 = vld [vmem:[#allocation2 + $0x50] sm:$0xff] }
 0x5bd   : > { %2720 = vst [vmem:[%s3970_s16 + $0x10] sm:$0xff] %v2688_v23  ;;  %v2691_v63 = vld [vmem:[#allocation2 + $0x68] sm:$0xff]  ;;  %2721 = vst [vmem:[%s3970_s16 + $0x18] sm:$0xff] %v2689_v62  ;;  %v2692_v14 = vld [vmem:[#allocation2 + $0x30] sm:$0xff] }
 0x5be   : > { %2722 = vst [vmem:[%s3970_s16 + $0x20] sm:$0xff] %v2690_v11  ;;  %2723 = vst [vmem:[%s3970_s16 + $0x28] sm:$0xff] %v2691_v63  ;;  %v2693_v56 = vld [vmem:[#allocation2 + $0x48] sm:$0xff]  ;;  %v2694_v25 = vld [vmem:[#allocation2 + $0x80] sm:$0xff] }
 0x5bf   : > { %2724 = vst [vmem:[%s3970_s16 + $0x30] sm:$0xff] %v2692_v14  ;;  %2725 = vst [vmem:[%s3970_s16 + $0x38] sm:$0xff] %v2693_v56  ;;  %v2695_v58 = vld [vmem:[#allocation2 + $0x88] sm:$0xff]  ;;  %v2697_v53 = vld [vmem:[#allocation2 + $0xb8] sm:$0xff] }
 0x5c0   : > { %2726 = vst [vmem:[%s3970_s16 + $0x40] sm:$0xff] %v2694_v25  ;;  %v2696_v60 = vld [vmem:[#allocation2 + $0xe8] sm:$0xff]  ;;  %2727 = vst [vmem:[%s3970_s16 + $0x48] sm:$0xff] %v2695_v58  ;;  %v2698_v41 = vld [vmem:[#allocation2 + $0x60] sm:$0xff] }
 0x5c1   : > { %2728 = vst [vmem:[%s3970_s16 + $0x50] sm:$0xff] %v2696_v60  ;;  %2729 = vst [vmem:[%s3970_s16 + $0x58] sm:$0xff] %v2697_v53  ;;  %v2699_v19 = vld [vmem:[#allocation2 + $0xf0] sm:$0xff]  ;;  %v2700_v30 = vld [vmem:[#allocation2 + $0x8] sm:$0xff] }
 0x5c2   : > { %2730 = vst [vmem:[%s3970_s16 + $0x60] sm:$0xff] %v2698_v41  ;;  %2731 = vst [vmem:[%s3970_s16 + $0x68] sm:$0xff] %v2699_v19  ;;  %v2701_v35 = vld [vmem:[#allocation2 + $0x78] sm:$0xff]  ;;  %v2704_v37 = vld [vmem:[#allocation2 + $0x40] sm:$0xff] }
 0x5c3   : > { %2732 = vst [vmem:[%s3970_s16 + $0x70] sm:$0xff] %v2700_v30  ;;  %v2702_v18 = vld [vmem:[#allocation2 + $0x38] sm:$0xff]  ;;  %2733 = vst [vmem:[%s3970_s16 + $0x78] sm:$0xff] %v2701_v35  ;;  %v2705_v7 = vld [vmem:[#allocation2 + $0xc8] sm:$0xff] }
 0x5c4   : > { %v2703_v40 = vld [vmem:[#allocation2 + $0x58] sm:$0xff]  ;;  %2734 = vst [vmem:[%s3970_s16 + $0x80] sm:$0xff] %v2702_v18  ;;  %v2706_v0 = vld [vmem:[#allocation2 + $0xe0] sm:$0xff]  ;;  %2736 = vst [vmem:[%s3970_s16 + $0x90] sm:$0xff] %v2704_v37 }
 0x5c5   : > { %2735 = vst [vmem:[%s3970_s16 + $0x88] sm:$0xff] %v2703_v40  ;;  %2737 = vst [vmem:[%s3970_s16 + $0x98] sm:$0xff] %v2705_v7  ;;  %v2707_v55 = vld [vmem:[#allocation2 + $0x90] sm:$0xff]  ;;  %v2709_v17 = vld [vmem:[#allocation2 + $0xc0] sm:$0xff] }
 0x5c6   : > { %2738 = vst [vmem:[%s3970_s16 + $0xa0] sm:$0xff] %v2706_v0  ;;  %v2708_v3 = vld [vmem:[#allocation2 + $0x70] sm:$0xff]  ;;  %2739 = vst [vmem:[%s3970_s16 + $0xa8] sm:$0xff] %v2707_v55  ;;  %v2710_v29 = vld [vmem:[#allocation2 + $0xa8] sm:$0xff] }
 0x5c7   : > { %2740 = vst [vmem:[%s3970_s16 + $0xb0] sm:$0xff] %v2708_v3  ;;  %2741 = vst [vmem:[%s3970_s16 + $0xb8] sm:$0xff] %v2709_v17  ;;  %v2711_v54 = vld [vmem:[#allocation2 + $0xd0] sm:$0xff]  ;;  %v2713_v51 = vld [vmem:[#allocation2 + $0x28] sm:$0xff] }
 0x5c8   : > { %v2712_v52 = vld [vmem:[#allocation2 + $0x10] sm:$0xff]  ;;  %2742 = vst [vmem:[%s3970_s16 + $0xc0] sm:$0xff] %v2710_v29  ;;  %2743 = vst [vmem:[%s3970_s16 + $0xc8] sm:$0xff] %v2711_v54  ;;  %v2714_v22 = vld [vmem:[#allocation2 + $0xa0] sm:$0xff] }
 0x5c9   : > { %2744 = vst [vmem:[%s3970_s16 + $0xd0] sm:$0xff] %v2712_v52  ;;  %v2715_v39 = vld [vmem:[#allocation2 + $0xf8] sm:$0xff]  ;;  %2745 = vst [vmem:[%s3970_s16 + $0xd8] sm:$0xff] %v2713_v51  ;;  %v2716_v10 = vld [vmem:[#allocation2 + $0x20] sm:$0xff] }
 0x5ca   : > { %2746 = vst [vmem:[%s3970_s16 + $0xe0] sm:$0xff] %v2714_v22  ;;  %2747 = vst [vmem:[%s3970_s16 + $0xe8] sm:$0xff] %v2715_v39  ;;  %v2717_v59 = vld [vmem:[#allocation2 + $0x98] sm:$0xff] }
 0x5cb   : > { %2748 = vst [vmem:[%s3970_s16 + $0xf0] sm:$0xff] %v2716_v10  ;;  %2749 = vst [vmem:[%s3970_s16 + $0xf8] sm:$0xff] %v2717_v59 }
 0x5cc PF: > { %s3051_s30 = sshll.u32 %s3796_s9, 12  ;;  %s2764_s0 = sshll.u32 %s3970_s16, 4  ;;  %s5005_s0 = int_to_ptr.vmem [resolvable:$true] %s2764_s0 }
 0x5cd   : > { %s5002_s14 = scalar_lea.hbm %s5068_s8, %s3051_s30  ;;  %s5165_s27 = sand.u32 1, %s3784_s28  }
 0x5ce   : > { %s5009_s29 = scalar_lea.sflag [#allocation4], %s5165_s27  ;;  %s3716_s10 = scalar_lea.vmem %s5005_s0, 4096 }
 0x5cf   : > { %p3717_p2 = scmp.ne.s32.totalorder %s5005_s0, %s3716_s10  ;;  %s3813_s9 = smov [#allocation3]  }
 0x5d0   : > { %s3720_s11 = sshll.u32 %s3813_s9, 4  ;;  %s3721_s11 = int_to_ptr.vmem [resolvable:$false] %s3720_s11 }
 0x5d1   : > { %p3718_p4 = pnand %p3717_p2, %p3910_p3  ;;  %s3722_s12 = scalar_lea.vmem %s3721_s11, 8192 }
 0x5d2   : > { %p3723_p6 = scmp.lt.s32.totalorder %s5005_s0, %s3721_s11  ;;  %p3724_p7 = scmp.lt.s32.totalorder %s3722_s12, %s3716_s10 }
 0x5d3   : > { %p3719_p5 = pneg %p3718_p4 }
 0x5d4   : > { %p3725_p8 = por %p3724_p7, %p3723_p6 }
 0x5d6   : > { %p3726_p10 = pnand %p3725_p8, %p3719_p5 }
 0x5d8   : > { %3729 = shalt.err (!%p3726_p10)
}
 0x5d9   : > { %s3730_s16 = scalar_lea.hbm %s5002_s14, 4096  ;;  %s3734_s22 = scalar_lea.hbm %s5068_s8, 8192 }
 0x5da   : > { %p3731_p11 = scmp.ne.s32.totalorder %s5002_s14, %s3730_s16  ;;  %p3735_p0 = scmp.lt.s32.totalorder %s5002_s14, %s5068_s8 }
 0x5db   : > { %p3736_p1 = scmp.lt.s32.totalorder %s3734_s22, %s3730_s16 }
 0x5dc   : > { %p3732_p12 = pnand %p3731_p11, %p3910_p3 }
 0x5dd   : > { %p3737_p2 = por %p3736_p1, %p3735_p0 }
 0x5de   : > { %p3733_p13 = pneg %p3732_p12 }
 0x5e0   : > { %p3738_p4 = pnand %p3737_p2, %p3733_p13 }
 0x5e2   : > { %3741 = shalt.err (!%p3738_p4)
}
 0x5e3   : > { %s3814_s19 = smov 256   ;;  %s3815_s20 = smov 16  }
 0x5e4   : > { %3492 = dma.vmem_to_hbm [thread:$0]  (%p3910_p3), %s5005_s0, 4096, %s5002_s14, %s5009_s29, %s3814_s19, %s3814_s19, %s3815_s20  }
 0x5e5 PF: > { %s5166_s24 = sld [smem:[#allocation10_spill]] }
 0x5e6   : > { %s5167_s26 = sld [smem:[#allocation6_spill]] }
 0x5eb   : > { %p3498_p5 = scmp.ge.s32.totalorder %s5166_s24, 2 }
 0x5ec   : > { %s2779_s15 = sand.u32 1, %s5167_s26  }
 0x5ed   : > { %p3495_p6 = pnand %p3498_p5, %p3920_p9  ;;  %s2780_s13 = scalar_lea.sflag [#allocation4], %s2779_s15 }
 0x5ef   : > { %p3496_p7 = pneg %p3495_p6 }
 0x5f1   : > { %3775 = dma.done.wait (%p3496_p7), %s2780_s13, 4096  }
 0x5f2   : > { %3777 = vsyncadd (%p3496_p7), %s2780_s13, 4294963200  ;;  %s21_s12 = sadd.s32 1, %s5166_s24   ;;  %s5169_s10 = sld [smem:[#allocation7_spill]] }
 0x5f3   : > { %p18_p8 = scmp.ge.s32.totalorder %s21_s12, 10   ;;  %s5170_s29 = sld [smem:[#allocation14_spill]] }
 0x5f4   : > { %s5171_s30 = sld [smem:[#allocation8_spill]]  ;;  %s5175_s27 = smov %s3784_s28 }
 0x5f5   : > { %s5172_s9 = sld [smem:[#allocation9_spill]] }
 0x5f6   : > { %s5173_s17 = sld [smem:[#allocation11_spill]] }
 0x5f7   : > { %s5174_s11 = sld [smem:[#allocation12_spill]] }
 0x5f8   : > { %s5176_s28 = smov %s5169_s10  ;;  %20 = sbr.rel (!%p18_p8) target bundleno = 7 (0x7), region = 110 }
 0x5fc   : > { %s5177_s10 = smov %s5173_s17 }
 0x5fd   :  { %2785 = vsyncpa [#allocation4], 1 }
 0x5fe   :  { %2787 = vsyncpa [#allocation4 + $0x1], 1 }

</bundles_post_ra>
